<compile_context>
chip_gen: v5e
topology: v5e:2x2
jax: 0.10.0
libtpu: 0.0.40
codegen_flags: <defaults>
</compile_context>

<pallas_src>
import functools

import jax
import jax.numpy as jnp
import numpy as np
from jax import lax
from jax.experimental import pallas as pl
from jax.experimental.pallas import tpu as pltpu

BLK = 8  # boxes handled per serial block (one sublane group)


def _nms_kernel(boxes_ref, blkrows_ref, keep_ref, *, threshold, num_blocks, n_valid):
    """Blocked greedy NMS over score-sorted boxes.

    boxes_ref   : (N, 4) f32 — sorted boxes, column layout (box index on sublanes)
    blkrows_ref : (BLK*num_blocks, BLK) f32 — rows [b*BLK + c] hold coordinate c of block
                  b's boxes with the box-in-block index on the lane axis
    keep_ref    : (N, 1) f32 output — 1.0 if the box survives suppression (column layout)
    """
    n = boxes_ref.shape[0]
    thr = jnp.float32(threshold)

    row_idx = lax.broadcasted_iota(jnp.int32, (n, 1), 0)        # global box index (sublanes)
    keep_ref[...] = (row_idx < n_valid).astype(jnp.float32)     # init: real boxes kept, padding dead

    # Column-layout coordinates of all boxes (box index on the sublane axis).
    x1c = boxes_ref[:, 0:1]
    y1c = boxes_ref[:, 1:2]
    x2c = boxes_ref[:, 2:3]
    y2c = boxes_ref[:, 3:4]
    area_c = (x2c - x1c) * (y2c - y1c)                          # (N, 1)

    def block_step(b, carry):
        base = pl.multiple_of(b * BLK, BLK)

        # Row-layout coords of this block's BLK boxes (box-in-block on the lane axis).
        rc = blkrows_ref[pl.ds(base, BLK), :]                   # (BLK, BLK)
        x1r = rc[0:1, :]
        y1r = rc[1:2, :]
        x2r = rc[2:3, :]
        y2r = rc[3:4, :]
        area_r = (x2r - x1r) * (y2r - y1r)                      # (1, BLK)

        # (N, BLK) suppression panel: block box r suppresses global box j iff
        # iou > thr and j > base + r (triangular mask folded in here, vectorized once).
        xx1 = jnp.maximum(x1c, x1r)
        yy1 = jnp.maximum(y1c, y1r)
        xx2 = jnp.minimum(x2c, x2r)
        yy2 = jnp.minimum(y2c, y2r)
        w = jnp.maximum(xx2 - xx1, 0.0)
        h = jnp.maximum(yy2 - yy1, 0.0)
        inter = w * h
        iou = inter / jnp.maximum(area_c + area_r - inter, 1e-9)
        lane_i = lax.broadcasted_iota(jnp.int32, (n, BLK), 1)
        panel = jnp.where((iou > thr) & (row_idx > base + lane_i), 1.0, 0.0)   # (N, BLK)

        # (BLK, BLK) intra-block suppression; column r = block boxes killed by block box r.
        bc = boxes_ref[pl.ds(base, BLK), :]                     # (BLK, 4) column layout
        bx1c = bc[:, 0:1]
        by1c = bc[:, 1:2]
        bx2c = bc[:, 2:3]
        by2c = bc[:, 3:4]
        barea_c = (bx2c - bx1c) * (by2c - by1c)                 # (BLK, 1)
        ixx1 = jnp.maximum(bx1c, x1r)
        iyy1 = jnp.maximum(by1c, y1r)
        ixx2 = jnp.minimum(bx2c, x2r)
        iyy2 = jnp.minimum(by2c, y2r)
        iw = jnp.maximum(ixx2 - ixx1, 0.0)
        ih = jnp.maximum(iyy2 - iyy1, 0.0)
        iinter = iw * ih
        iiou = iinter / jnp.maximum(barea_c + area_r - iinter, 1e-9)
        sub_i = lax.broadcasted_iota(jnp.int32, (BLK, BLK), 0)
        lan_i = lax.broadcasted_iota(jnp.int32, (BLK, BLK), 1)
        intraT = jnp.where((iiou > thr) & (sub_i > lan_i), 1.0, 0.0)           # (BLK, BLK)

        # Sequential greedy inside the block: BLK short vreg steps on an (BLK,1) column.
        # No cross-lane reduces and no per-row dynamic loads on the serial chain.
        kb = keep_ref[pl.ds(base, BLK), :]                      # (BLK, 1) pre-block keep state
        for r in range(BLK):
            g = kb[r:r + 1, 0:1]                                # (1,1) keep flag of box base+r
            kb = kb * (1.0 - g * intraT[:, r:r + 1])

        # Broadcast this block's kept boxes' suppression to all later boxes at once.
        supp = kb[0:1, 0:1] * panel[:, 0:1]
        for r in range(1, BLK):
            supp = supp + kb[r:r + 1, 0:1] * panel[:, r:r + 1]
        keep_ref[...] = jnp.where(supp > 0.5, 0.0, keep_ref[...])
        return carry

    lax.fori_loop(0, num_blocks, block_step, 0)


def nms_pallas(rois, scores, threshold, max_out):
    """Equivalent of `Nms(threshold, max).forward(rois, scores)`.

    Returns (keep_idx, num_keep): keep_idx is (max_out,) int32, padded with -1;
    the first `num_keep` entries are the kept box indices in descending score order.
    """
    n_real = rois.shape[0]
    rois = rois.astype(jnp.float32)
    scores = scores.astype(jnp.float32)

    order = jnp.argsort(-scores)                 # descending score order
    boxes_sorted = rois[order]                   # (n_real, 4)

    n = ((n_real + BLK - 1) // BLK) * BLK        # pad box count to a multiple of BLK
    if n != n_real:
        boxes_sorted = jnp.pad(boxes_sorted, ((0, n - n_real), (0, 0)))
    num_blocks = n // BLK

    # Lane-major per-block coordinate slab: rows [b*BLK + c] hold coordinate c of block b's
    # boxes, with the box-in-block index on the lane axis (rows c >= 4 are zero padding).
    blk_rows = boxes_sorted.reshape(num_blocks, BLK, 4).transpose(0, 2, 1)   # (B, 4, BLK)
    blk_rows = jnp.pad(blk_rows, ((0, 0), (0, BLK - 4), (0, 0)))             # (B, BLK, BLK)
    blk_rows = blk_rows.reshape(num_blocks * BLK, BLK)

    keep_col = pl.pallas_call(
        functools.partial(
            _nms_kernel,
            threshold=float(threshold),
            num_blocks=num_blocks,
            n_valid=n_real,
        ),
        grid=(1,),
        in_specs=[
            pl.BlockSpec((n, 4), lambda i: (0, 0)),
            pl.BlockSpec((num_blocks * BLK, BLK), lambda i: (0, 0)),
        ],
        out_specs=pl.BlockSpec((n, 1), lambda i: (0, 0)),
        out_shape=jax.ShapeDtypeStruct((n, 1), jnp.float32),
        compiler_params=pltpu.CompilerParams(dimension_semantics=("arbitrary",)),
    )(boxes_sorted, blk_rows)

    mask = keep_col[:n_real, 0] > 0.5            # (n_real,) keep flags, in sorted order
    pos = jnp.where(mask, jnp.arange(n_real), n_real)
    pos = jnp.sort(pos)[:max_out]
    safe = jnp.minimum(pos, n_real - 1)
    keep_idx = jnp.where(pos < n_real, order[safe], -1).astype(jnp.int32)
    num_keep = jnp.minimum(jnp.sum(mask), max_out).astype(jnp.int32)
    return keep_idx, num_keep


def _reference_nms(boxes, order, threshold, max_out):
    """Pure numpy greedy NMS over the same score order (float32 math to match kernel)."""
    order = np.asarray(order)
    b = np.asarray(boxes, np.float32)[order]
    n = b.shape[0]
    x1, y1, x2, y2 = b[:, 0], b[:, 1], b[:, 2], b[:, 3]
    area = (x2 - x1) * (y2 - y1)
    keep = np.ones(n, bool)
    thr = np.float32(threshold)
    for i in range(n):
        if not keep[i]:
            continue
        xx1 = np.maximum(x1[i], x1)
        yy1 = np.maximum(y1[i], y1)
        xx2 = np.minimum(x2[i], x2)
        yy2 = np.minimum(y2[i], y2)
        w = np.maximum(xx2 - xx1, np.float32(0.0))
        h = np.maximum(yy2 - yy1, np.float32(0.0))
        inter = w * h
        union = area[i] + area - inter
        iou = inter / np.maximum(union, np.float32(1e-9))
        kill = (np.arange(n) > i) & (iou > thr)
        keep &= ~kill
    kept = order[np.nonzero(keep)[0]]
    return kept[:max_out]


if __name__ == "__main__":
    key = jax.random.PRNGKey(0)
    k1, k2, k3 = jax.random.split(key, 3)

    N = 128
    THRESHOLD = 0.5
    MAX_KEEP = 32

    xy = jax.random.uniform(k1, (N, 2), jnp.float32, 0.0, 64.0)
    wh = jax.random.uniform(k2, (N, 2), jnp.float32, 4.0, 32.0)
    rois = jnp.concatenate([xy, xy + wh], axis=-1)          # (N, 4) [x1, y1, x2, y2]
    scores = jax.random.uniform(k3, (N,), jnp.float32)      # (N,)

    keep_idx, num_keep = jax.block_until_ready(
        nms_pallas(rois, scores, THRESHOLD, MAX_KEEP)
    )

    # Cross-check against a pure-numpy greedy reference using the same score order.
    order_np = np.asarray(jnp.argsort(-scores))
    ref = _reference_nms(np.asarray(rois), order_np, THRESHOLD, MAX_KEEP)
    got = np.asarray(keep_idx)[: int(num_keep)]
    assert got.shape[0] == ref.shape[0], (got, ref)
    assert np.array_equal(got, ref), (got, ref)

    print("KERNEL_OK")
</pallas_src>

<mosaic_0001>
module attributes {stable_mosaic.version = 11 : i64} {
  func.func @_nms_kernel(%arg0: i32, %arg1: memref<128x4xf32, #tpu.memory_space<vmem>>, %arg2: memref<128x8xf32, #tpu.memory_space<vmem>>, %arg3: memref<128x1xf32, #tpu.memory_space<vmem>>) attributes {dimension_semantics = [#tpu.dimension_semantics<arbitrary>], iteration_bounds = array<i64: 1>, scalar_prefetch = 0 : i64, scratch_operands = 0 : i64, tpu.core_type = #tpu.core_type<tc>, window_params = [{pipeline_mode = #tpu.pipeline_mode<synchronous>, transform_indices = @transform_0, window_bounds = array<i64: 128, 4>}, {pipeline_mode = #tpu.pipeline_mode<synchronous>, transform_indices = @transform_1, window_bounds = array<i64: 128, 8>}, {pipeline_mode = #tpu.pipeline_mode<synchronous>, transform_indices = @transform_2, window_bounds = array<i64: 128, 1>}]} {
    %0 = tpu.iota {dimensions = array<i32: 0>} : vector<128x1xi32>
    %c128_i32 = arith.constant 128 : i32
    %1 = vector.broadcast %c128_i32 : i32 to vector<128x1xi32>
    %2 = arith.cmpi slt, %0, %1 : vector<128x1xi32>
    %3 = arith.extui %2 : vector<128x1xi1> to vector<128x1xi32>
    %4 = arith.sitofp %3 : vector<128x1xi32> to vector<128x1xf32>
    %c0 = arith.constant 0 : index
    %c0_0 = arith.constant 0 : index
    %5 = vector.load %arg3[%c0, %c0_0] : memref<128x1xf32, #tpu.memory_space<vmem>>, vector<128x1xf32>
    tpu.vector_store %arg3[%c0, %c0_0], %4 {strides = array<i32>} : memref<128x1xf32, #tpu.memory_space<vmem>>, vector<128x1xf32>,
    %c0_1 = arith.constant 0 : index
    %c0_2 = arith.constant 0 : index
    %6 = vector.load %arg1[%c0_1, %c0_2] : memref<128x4xf32, #tpu.memory_space<vmem>>, vector<128x1xf32>
    %c0_3 = arith.constant 0 : index
    %c1 = arith.constant 1 : index
    %7 = vector.load %arg1[%c0_3, %c1] : memref<128x4xf32, #tpu.memory_space<vmem>>, vector<128x1xf32>
    %c0_4 = arith.constant 0 : index
    %c2 = arith.constant 2 : index
    %8 = vector.load %arg1[%c0_4, %c2] : memref<128x4xf32, #tpu.memory_space<vmem>>, vector<128x1xf32>
    %c0_5 = arith.constant 0 : index
    %c3 = arith.constant 3 : index
    %9 = vector.load %arg1[%c0_5, %c3] : memref<128x4xf32, #tpu.memory_space<vmem>>, vector<128x1xf32>
    %10 = arith.subf %8, %6 : vector<128x1xf32>
    %11 = arith.subf %9, %7 : vector<128x1xf32>
    %12 = arith.mulf %10, %11 : vector<128x1xf32>
    %cst = arith.constant 5.000000e-01 : f32
    %c0_i32 = arith.constant 0 : i32
    %c16_i32 = arith.constant 16 : i32
    %13 = arith.addi %c0_i32, %c16_i32 : i32
    %c1_i32 = arith.constant 1 : i32
    scf.for %arg4 = %c0_i32 to %13 step %c1_i32  : i32 {
      %c8_i32 = arith.constant 8 : i32
      %14 = arith.muli %arg4, %c8_i32 : i32
      %15 = tpu.assume_multiple %14, 8 : i32
      %16 = arith.index_cast %15 : i32 to index
      %c0_7 = arith.constant 0 : index
      %17 = vector.load %arg2[%16, %c0_7] : memref<128x8xf32, #tpu.memory_space<vmem>>, vector<8x8xf32>
      %18 = vector.extract_strided_slice %17 {offsets = [0, 0], sizes = [1, 8], strides = [1, 1]} : vector<8x8xf32> to vector<1x8xf32>
      %19 = vector.extract_strided_slice %17 {offsets = [1, 0], sizes = [1, 8], strides = [1, 1]} : vector<8x8xf32> to vector<1x8xf32>
      %20 = vector.extract_strided_slice %17 {offsets = [2, 0], sizes = [1, 8], strides = [1, 1]} : vector<8x8xf32> to vector<1x8xf32>
      %21 = vector.extract_strided_slice %17 {offsets = [3, 0], sizes = [1, 8], strides = [1, 1]} : vector<8x8xf32> to vector<1x8xf32>
      %22 = arith.subf %20, %18 : vector<1x8xf32>
      %23 = arith.subf %21, %19 : vector<1x8xf32>
      %24 = arith.mulf %22, %23 : vector<1x8xf32>
      %25 = vector.broadcast %6 : vector<128x1xf32> to vector<128x8xf32>
      %26 = vector.broadcast %18 : vector<1x8xf32> to vector<128x8xf32>
      %27 = arith.maximumf %25, %26 : vector<128x8xf32>
      %28 = vector.broadcast %7 : vector<128x1xf32> to vector<128x8xf32>
      %29 = vector.broadcast %19 : vector<1x8xf32> to vector<128x8xf32>
      %30 = arith.maximumf %28, %29 : vector<128x8xf32>
      %31 = vector.broadcast %8 : vector<128x1xf32> to vector<128x8xf32>
      %32 = vector.broadcast %20 : vector<1x8xf32> to vector<128x8xf32>
      %33 = arith.minimumf %31, %32 : vector<128x8xf32>
      %34 = vector.broadcast %9 : vector<128x1xf32> to vector<128x8xf32>
      %35 = vector.broadcast %21 : vector<1x8xf32> to vector<128x8xf32>
      %36 = arith.minimumf %34, %35 : vector<128x8xf32>
      %37 = arith.subf %33, %27 : vector<128x8xf32>
      %cst_8 = arith.constant 0.000000e+00 : f32
      %38 = vector.broadcast %cst_8 : f32 to vector<128x8xf32>
      %39 = arith.maximumf %37, %38 : vector<128x8xf32>
      %40 = arith.subf %36, %30 : vector<128x8xf32>
      %cst_9 = arith.constant 0.000000e+00 : f32
      %41 = vector.broadcast %cst_9 : f32 to vector<128x8xf32>
      %42 = arith.maximumf %40, %41 : vector<128x8xf32>
      %43 = arith.mulf %39, %42 : vector<128x8xf32>
      %44 = vector.broadcast %12 : vector<128x1xf32> to vector<128x8xf32>
      %45 = vector.broadcast %24 : vector<1x8xf32> to vector<128x8xf32>
      %46 = arith.addf %44, %45 : vector<128x8xf32>
      %47 = arith.subf %46, %43 : vector<128x8xf32>
      %cst_10 = arith.constant 9.99999971E-10 : f32
      %48 = vector.broadcast %cst_10 : f32 to vector<128x8xf32>
      %49 = arith.maximumf %47, %48 : vector<128x8xf32>
      %50 = arith.divf %43, %49 : vector<128x8xf32>
      %51 = tpu.iota {dimensions = array<i32: 1>} : vector<128x8xi32>
      %52 = vector.broadcast %cst : f32 to vector<128x8xf32>
      %53 = arith.cmpf ogt, %50, %52 : vector<128x8xf32>
      %54 = vector.broadcast %15 : i32 to vector<128x8xi32>
      %55 = arith.addi %54, %51 : vector<128x8xi32>
      %56 = vector.broadcast %0 : vector<128x1xi32> to vector<128x8xi32>
      %57 = arith.cmpi sgt, %56, %55 : vector<128x8xi32>
      %58 = arith.andi %53, %57 : vector<128x8xi1>
      %cst_11 = arith.constant 1.000000e+00 : f32
      %cst_12 = arith.constant 0.000000e+00 : f32
      %59 = vector.broadcast %cst_11 : f32 to vector<128x8xf32>
      %60 = vector.broadcast %cst_12 : f32 to vector<128x8xf32>
      %61 = arith.select %58, %59, %60 : vector<128x8xi1>, vector<128x8xf32>
      %62 = arith.index_cast %15 : i32 to index
      %c0_13 = arith.constant 0 : index
      %63 = vector.load %arg1[%62, %c0_13] : memref<128x4xf32, #tpu.memory_space<vmem>>, vector<8x4xf32>
      %64 = vector.extract_strided_slice %63 {offsets = [0, 0], sizes = [8, 1], strides = [1, 1]} : vector<8x4xf32> to vector<8x1xf32>
      %65 = vector.extract_strided_slice %63 {offsets = [0, 1], sizes = [8, 1], strides = [1, 1]} : vector<8x4xf32> to vector<8x1xf32>
      %66 = vector.extract_strided_slice %63 {offsets = [0, 2], sizes = [8, 1], strides = [1, 1]} : vector<8x4xf32> to vector<8x1xf32>
      %67 = vector.extract_strided_slice %63 {offsets = [0, 3], sizes = [8, 1], strides = [1, 1]} : vector<8x4xf32> to vector<8x1xf32>
      %68 = arith.subf %66, %64 : vector<8x1xf32>
      %69 = arith.subf %67, %65 : vector<8x1xf32>
      %70 = arith.mulf %68, %69 : vector<8x1xf32>
      %71 = vector.broadcast %64 : vector<8x1xf32> to vector<8x8xf32>
      %72 = vector.broadcast %18 : vector<1x8xf32> to vector<8x8xf32>
      %73 = arith.maximumf %71, %72 : vector<8x8xf32>
      %74 = vector.broadcast %65 : vector<8x1xf32> to vector<8x8xf32>
      %75 = vector.broadcast %19 : vector<1x8xf32> to vector<8x8xf32>
      %76 = arith.maximumf %74, %75 : vector<8x8xf32>
      %77 = vector.broadcast %66 : vector<8x1xf32> to vector<8x8xf32>
      %78 = vector.broadcast %20 : vector<1x8xf32> to vector<8x8xf32>
      %79 = arith.minimumf %77, %78 : vector<8x8xf32>
      %80 = vector.broadcast %67 : vector<8x1xf32> to vector<8x8xf32>
      %81 = vector.broadcast %21 : vector<1x8xf32> to vector<8x8xf32>
      %82 = arith.minimumf %80, %81 : vector<8x8xf32>
      %83 = arith.subf %79, %73 : vector<8x8xf32>
      %cst_14 = arith.constant 0.000000e+00 : f32
      %84 = vector.broadcast %cst_14 : f32 to vector<8x8xf32>
      %85 = arith.maximumf %83, %84 : vector<8x8xf32>
      %86 = arith.subf %82, %76 : vector<8x8xf32>
      %cst_15 = arith.constant 0.000000e+00 : f32
      %87 = vector.broadcast %cst_15 : f32 to vector<8x8xf32>
      %88 = arith.maximumf %86, %87 : vector<8x8xf32>
      %89 = arith.mulf %85, %88 : vector<8x8xf32>
      %90 = vector.broadcast %70 : vector<8x1xf32> to vector<8x8xf32>
      %91 = vector.broadcast %24 : vector<1x8xf32> to vector<8x8xf32>
      %92 = arith.addf %90, %91 : vector<8x8xf32>
      %93 = arith.subf %92, %89 : vector<8x8xf32>
      %cst_16 = arith.constant 9.99999971E-10 : f32
      %94 = vector.broadcast %cst_16 : f32 to vector<8x8xf32>
      %95 = arith.maximumf %93, %94 : vector<8x8xf32>
      %96 = arith.divf %89, %95 : vector<8x8xf32>
      %97 = tpu.iota {dimensions = array<i32: 0>} : vector<8x8xi32>
      %98 = tpu.iota {dimensions = array<i32: 1>} : vector<8x8xi32>
      %99 = vector.broadcast %cst : f32 to vector<8x8xf32>
      %100 = arith.cmpf ogt, %96, %99 : vector<8x8xf32>
      %101 = arith.cmpi sgt, %97, %98 : vector<8x8xi32>
      %102 = arith.andi %100, %101 : vector<8x8xi1>
      %cst_17 = arith.constant 1.000000e+00 : f32
      %cst_18 = arith.constant 0.000000e+00 : f32
      %103 = vector.broadcast %cst_17 : f32 to vector<8x8xf32>
      %104 = vector.broadcast %cst_18 : f32 to vector<8x8xf32>
      %105 = arith.select %102, %103, %104 : vector<8x8xi1>, vector<8x8xf32>
      %106 = arith.index_cast %15 : i32 to index
      %c0_19 = arith.constant 0 : index
      %107 = vector.load %arg3[%106, %c0_19] : memref<128x1xf32, #tpu.memory_space<vmem>>, vector<8x1xf32>
      %108 = vector.extract_strided_slice %107 {offsets = [0, 0], sizes = [1, 1], strides = [1, 1]} : vector<8x1xf32> to vector<1x1xf32>
      %109 = vector.extract_strided_slice %105 {offsets = [0, 0], sizes = [8, 1], strides = [1, 1]} : vector<8x8xf32> to vector<8x1xf32>
      %110 = vector.broadcast %108 : vector<1x1xf32> to vector<8x1xf32>
      %111 = arith.mulf %110, %109 : vector<8x1xf32>
      %cst_20 = arith.constant 1.000000e+00 : f32
      %112 = vector.broadcast %cst_20 : f32 to vector<8x1xf32>
      %113 = arith.subf %112, %111 : vector<8x1xf32>
      %114 = arith.mulf %107, %113 : vector<8x1xf32>
      %115 = vector.extract_strided_slice %114 {offsets = [1, 0], sizes = [1, 1], strides = [1, 1]} : vector<8x1xf32> to vector<1x1xf32>
      %116 = vector.extract_strided_slice %105 {offsets = [0, 1], sizes = [8, 1], strides = [1, 1]} : vector<8x8xf32> to vector<8x1xf32>
      %117 = vector.broadcast %115 : vector<1x1xf32> to vector<8x1xf32>
      %118 = arith.mulf %117, %116 : vector<8x1xf32>
      %cst_21 = arith.constant 1.000000e+00 : f32
      %119 = vector.broadcast %cst_21 : f32 to vector<8x1xf32>
      %120 = arith.subf %119, %118 : vector<8x1xf32>
      %121 = arith.mulf %114, %120 : vector<8x1xf32>
      %122 = vector.extract_strided_slice %121 {offsets = [2, 0], sizes = [1, 1], strides = [1, 1]} : vector<8x1xf32> to vector<1x1xf32>
      %123 = vector.extract_strided_slice %105 {offsets = [0, 2], sizes = [8, 1], strides = [1, 1]} : vector<8x8xf32> to vector<8x1xf32>
      %124 = vector.broadcast %122 : vector<1x1xf32> to vector<8x1xf32>
      %125 = arith.mulf %124, %123 : vector<8x1xf32>
      %cst_22 = arith.constant 1.000000e+00 : f32
      %126 = vector.broadcast %cst_22 : f32 to vector<8x1xf32>
      %127 = arith.subf %126, %125 : vector<8x1xf32>
      %128 = arith.mulf %121, %127 : vector<8x1xf32>
      %129 = vector.extract_strided_slice %128 {offsets = [3, 0], sizes = [1, 1], strides = [1, 1]} : vector<8x1xf32> to vector<1x1xf32>
      %130 = vector.extract_strided_slice %105 {offsets = [0, 3], sizes = [8, 1], strides = [1, 1]} : vector<8x8xf32> to vector<8x1xf32>
      %131 = vector.broadcast %129 : vector<1x1xf32> to vector<8x1xf32>
      %132 = arith.mulf %131, %130 : vector<8x1xf32>
      %cst_23 = arith.constant 1.000000e+00 : f32
      %133 = vector.broadcast %cst_23 : f32 to vector<8x1xf32>
      %134 = arith.subf %133, %132 : vector<8x1xf32>
      %135 = arith.mulf %128, %134 : vector<8x1xf32>
      %136 = vector.extract_strided_slice %135 {offsets = [4, 0], sizes = [1, 1], strides = [1, 1]} : vector<8x1xf32> to vector<1x1xf32>
      %137 = vector.extract_strided_slice %105 {offsets = [0, 4], sizes = [8, 1], strides = [1, 1]} : vector<8x8xf32> to vector<8x1xf32>
      %138 = vector.broadcast %136 : vector<1x1xf32> to vector<8x1xf32>
      %139 = arith.mulf %138, %137 : vector<8x1xf32>
      %cst_24 = arith.constant 1.000000e+00 : f32
      %140 = vector.broadcast %cst_24 : f32 to vector<8x1xf32>
      %141 = arith.subf %140, %139 : vector<8x1xf32>
      %142 = arith.mulf %135, %141 : vector<8x1xf32>
      %143 = vector.extract_strided_slice %142 {offsets = [5, 0], sizes = [1, 1], strides = [1, 1]} : vector<8x1xf32> to vector<1x1xf32>
      %144 = vector.extract_strided_slice %105 {offsets = [0, 5], sizes = [8, 1], strides = [1, 1]} : vector<8x8xf32> to vector<8x1xf32>
      %145 = vector.broadcast %143 : vector<1x1xf32> to vector<8x1xf32>
      %146 = arith.mulf %145, %144 : vector<8x1xf32>
      %cst_25 = arith.constant 1.000000e+00 : f32
      %147 = vector.broadcast %cst_25 : f32 to vector<8x1xf32>
      %148 = arith.subf %147, %146 : vector<8x1xf32>
      %149 = arith.mulf %142, %148 : vector<8x1xf32>
      %150 = vector.extract_strided_slice %149 {offsets = [6, 0], sizes = [1, 1], strides = [1, 1]} : vector<8x1xf32> to vector<1x1xf32>
      %151 = vector.extract_strided_slice %105 {offsets = [0, 6], sizes = [8, 1], strides = [1, 1]} : vector<8x8xf32> to vector<8x1xf32>
      %152 = vector.broadcast %150 : vector<1x1xf32> to vector<8x1xf32>
      %153 = arith.mulf %152, %151 : vector<8x1xf32>
      %cst_26 = arith.constant 1.000000e+00 : f32
      %154 = vector.broadcast %cst_26 : f32 to vector<8x1xf32>
      %155 = arith.subf %154, %153 : vector<8x1xf32>
      %156 = arith.mulf %149, %155 : vector<8x1xf32>
      %157 = vector.extract_strided_slice %156 {offsets = [7, 0], sizes = [1, 1], strides = [1, 1]} : vector<8x1xf32> to vector<1x1xf32>
      %158 = vector.extract_strided_slice %105 {offsets = [0, 7], sizes = [8, 1], strides = [1, 1]} : vector<8x8xf32> to vector<8x1xf32>
      %159 = vector.broadcast %157 : vector<1x1xf32> to vector<8x1xf32>
      %160 = arith.mulf %159, %158 : vector<8x1xf32>
      %cst_27 = arith.constant 1.000000e+00 : f32
      %161 = vector.broadcast %cst_27 : f32 to vector<8x1xf32>
      %162 = arith.subf %161, %160 : vector<8x1xf32>
      %163 = arith.mulf %156, %162 : vector<8x1xf32>
      %164 = vector.extract_strided_slice %163 {offsets = [0, 0], sizes = [1, 1], strides = [1, 1]} : vector<8x1xf32> to vector<1x1xf32>
      %165 = vector.extract_strided_slice %61 {offsets = [0, 0], sizes = [128, 1], strides = [1, 1]} : vector<128x8xf32> to vector<128x1xf32>
      %166 = vector.broadcast %164 : vector<1x1xf32> to vector<128x1xf32>
      %167 = arith.mulf %166, %165 : vector<128x1xf32>
      %168 = vector.extract_strided_slice %163 {offsets = [1, 0], sizes = [1, 1], strides = [1, 1]} : vector<8x1xf32> to vector<1x1xf32>
      %169 = vector.extract_strided_slice %61 {offsets = [0, 1], sizes = [128, 1], strides = [1, 1]} : vector<128x8xf32> to vector<128x1xf32>
      %170 = vector.broadcast %168 : vector<1x1xf32> to vector<128x1xf32>
      %171 = arith.mulf %170, %169 : vector<128x1xf32>
      %172 = arith.addf %167, %171 : vector<128x1xf32>
      %173 = vector.extract_strided_slice %163 {offsets = [2, 0], sizes = [1, 1], strides = [1, 1]} : vector<8x1xf32> to vector<1x1xf32>
      %174 = vector.extract_strided_slice %61 {offsets = [0, 2], sizes = [128, 1], strides = [1, 1]} : vector<128x8xf32> to vector<128x1xf32>
      %175 = vector.broadcast %173 : vector<1x1xf32> to vector<128x1xf32>
      %176 = arith.mulf %175, %174 : vector<128x1xf32>
      %177 = arith.addf %172, %176 : vector<128x1xf32>
      %178 = vector.extract_strided_slice %163 {offsets = [3, 0], sizes = [1, 1], strides = [1, 1]} : vector<8x1xf32> to vector<1x1xf32>
      %179 = vector.extract_strided_slice %61 {offsets = [0, 3], sizes = [128, 1], strides = [1, 1]} : vector<128x8xf32> to vector<128x1xf32>
      %180 = vector.broadcast %178 : vector<1x1xf32> to vector<128x1xf32>
      %181 = arith.mulf %180, %179 : vector<128x1xf32>
      %182 = arith.addf %177, %181 : vector<128x1xf32>
      %183 = vector.extract_strided_slice %163 {offsets = [4, 0], sizes = [1, 1], strides = [1, 1]} : vector<8x1xf32> to vector<1x1xf32>
      %184 = vector.extract_strided_slice %61 {offsets = [0, 4], sizes = [128, 1], strides = [1, 1]} : vector<128x8xf32> to vector<128x1xf32>
      %185 = vector.broadcast %183 : vector<1x1xf32> to vector<128x1xf32>
      %186 = arith.mulf %185, %184 : vector<128x1xf32>
      %187 = arith.addf %182, %186 : vector<128x1xf32>
      %188 = vector.extract_strided_slice %163 {offsets = [5, 0], sizes = [1, 1], strides = [1, 1]} : vector<8x1xf32> to vector<1x1xf32>
      %189 = vector.extract_strided_slice %61 {offsets = [0, 5], sizes = [128, 1], strides = [1, 1]} : vector<128x8xf32> to vector<128x1xf32>
      %190 = vector.broadcast %188 : vector<1x1xf32> to vector<128x1xf32>
      %191 = arith.mulf %190, %189 : vector<128x1xf32>
      %192 = arith.addf %187, %191 : vector<128x1xf32>
      %193 = vector.extract_strided_slice %163 {offsets = [6, 0], sizes = [1, 1], strides = [1, 1]} : vector<8x1xf32> to vector<1x1xf32>
      %194 = vector.extract_strided_slice %61 {offsets = [0, 6], sizes = [128, 1], strides = [1, 1]} : vector<128x8xf32> to vector<128x1xf32>
      %195 = vector.broadcast %193 : vector<1x1xf32> to vector<128x1xf32>
      %196 = arith.mulf %195, %194 : vector<128x1xf32>
      %197 = arith.addf %192, %196 : vector<128x1xf32>
      %198 = vector.extract_strided_slice %163 {offsets = [7, 0], sizes = [1, 1], strides = [1, 1]} : vector<8x1xf32> to vector<1x1xf32>
      %199 = vector.extract_strided_slice %61 {offsets = [0, 7], sizes = [128, 1], strides = [1, 1]} : vector<128x8xf32> to vector<128x1xf32>
      %200 = vector.broadcast %198 : vector<1x1xf32> to vector<128x1xf32>
      %201 = arith.mulf %200, %199 : vector<128x1xf32>
      %202 = arith.addf %197, %201 : vector<128x1xf32>
      %cst_28 = arith.constant 5.000000e-01 : f32
      %203 = vector.broadcast %cst_28 : f32 to vector<128x1xf32>
      %204 = arith.cmpf ogt, %202, %203 : vector<128x1xf32>
      %c0_29 = arith.constant 0 : index
      %c0_30 = arith.constant 0 : index
      %205 = vector.load %arg3[%c0_29, %c0_30] : memref<128x1xf32, #tpu.memory_space<vmem>>, vector<128x1xf32>
      %cst_31 = arith.constant 0.000000e+00 : f32
      %206 = vector.broadcast %cst_31 : f32 to vector<128x1xf32>
      %207 = arith.select %204, %206, %205 : vector<128x1xi1>, vector<128x1xf32>
      %c0_32 = arith.constant 0 : index
      %c0_33 = arith.constant 0 : index
      %208 = vector.load %arg3[%c0_32, %c0_33] : memref<128x1xf32, #tpu.memory_space<vmem>>, vector<128x1xf32>
      tpu.vector_store %arg3[%c0_32, %c0_33], %207 {strides = array<i32>} : memref<128x1xf32, #tpu.memory_space<vmem>>, vector<128x1xf32>,
    }
    %c16_i32_6 = arith.constant 16 : i32
    return
  }
  func.func @transform_0(%arg0: i32) -> (i32, i32) {
    %c0_i32 = arith.constant 0 : i32
    %c0_i32_0 = arith.constant 0 : i32
    %c0_i32_1 = arith.constant 0 : i32
    return %c0_i32, %c0_i32_0 : i32, i32
  }
  func.func @transform_1(%arg0: i32) -> (i32, i32) {
    %c0_i32 = arith.constant 0 : i32
    %c0_i32_0 = arith.constant 0 : i32
    %c0_i32_1 = arith.constant 0 : i32
    return %c0_i32, %c0_i32_0 : i32, i32
  }
  func.func @transform_2(%arg0: i32) -> (i32, i32) {
    %c0_i32 = arith.constant 0 : i32
    %c0_i32_0 = arith.constant 0 : i32
    %c0_i32_1 = arith.constant 0 : i32
    return %c0_i32, %c0_i32_0 : i32, i32
  }
}

</mosaic_0001>

<bundles_post_ra>
// kernel: tpu_custom_call.1
= control target key start
LH: loop header
LB: loop body
LE: loop exit
PB: predicated region body
PF: predicated region fallthrough
CT: control target
= control target key end

     0   :  { %s2290_s13 = smov 2   ;;  %s2291_s15 = smov 127   ;;  %v4248_v58 = vlaneseq  ;;  %vm76_vm0 = vcmask 7168   ;;  %s4245_s0 = inlined_call_operand.vmem [shape: f32[128,4], index: 0, kind: input, shape index: {}]   ;;  %s4246_s1 = inlined_call_operand.vmem [shape: f32[128,8], index: 1, kind: input, shape index: {}]   ;;  %s4247_s2 = inlined_call_operand.vmem [shape: f32[128,1], index: 2, kind: output, shape index: {}]  }
   0x1   :  { %v2324_v0 = vld [vmem:[%s4245_s0 + $0x10] sm:$0xff]  ;;  %v2329_v1 = vld [vmem:[%s4245_s0] sm:$0xff]  ;;  %v2345_v3 = vld [vmem:[%s4245_s0 + $0x18] sm:$0xff]  ;;  %s2637_s19 = smov 0  }
   0x2   :  { %4347 = vst [vmem:[#allocation2_spill] sm:$0xff] %v2324_v0  ;;  %129 = vrot.lane.b32.xlu1 %v2324_v0, %s2290_s13  ;;  %125 = vrot.lane.b32.xlu0 %v2329_v1, %s2290_s13  ;;  %v2338_v2 = vld [vmem:[%s4245_s0 + $0x20] sm:$0xff]  ;;  %v2350_v4 = vld [vmem:[%s4245_s0 + $0x8] sm:$0xff]  ;;  %v2497_v61 = vshrl.u32 %v4248_v58, 7 }
   0x3   :  { %4348 = vst [vmem:[#allocation3_spill] sm:$0xff] %v2329_v1  ;;  %133 = vrot.lane.b32.xlu2 %v2338_v2, %s2290_s13  ;;  %v2355_v5 = vld [vmem:[%s4245_s0 + $0x28] sm:$0xff]  ;;  %v2366_v6 = vld [vmem:[%s4245_s0 + $0x30] sm:$0xff]  ;;  %v2371_v7 = vld [vmem:[%s4245_s0 + $0x38] sm:$0xff] }
   0x4   :  { %4349 = vst [vmem:[#allocation4_spill] sm:$0xff] %v2338_v2  ;;  %v2376_v8 = vld [vmem:[%s4245_s0 + $0x40] sm:$0xff]  ;;  %v2387_v9 = vld [vmem:[%s4245_s0 + $0x48] sm:$0xff]  ;;  %v2392_v10 = vld [vmem:[%s4245_s0 + $0x50] sm:$0xff] }
   0x5   :  { %4350 = vst [vmem:[#allocation5_spill] sm:$0xff] %v2345_v3  ;;  %v2397_v11 = vld [vmem:[%s4245_s0 + $0x58] sm:$0xff]  ;;  %v2408_v12 = vld [vmem:[%s4245_s0 + $0x60] sm:$0xff]  ;;  %v2413_v13 = vld [vmem:[%s4245_s0 + $0x68] sm:$0xff] }
   0x6   :  { %4351 = vst [vmem:[#allocation6_spill] sm:$0xff] %v2350_v4  ;;  %v2418_v14 = vld [vmem:[%s4245_s0 + $0x70] sm:$0xff]  ;;  %v2429_v15 = vld [vmem:[%s4245_s0 + $0x78] sm:$0xff] }
   0x7   :  { %4352 = vst [vmem:[#allocation7_spill] sm:$0xff] %v2355_v5 }
   0x8   :  { %4353 = vst [vmem:[#allocation8_spill] sm:$0xff] %v2366_v6 }
   0x9   :  { %4354 = vst [vmem:[#allocation9_spill] sm:$0xff] %v2371_v7 }
   0xa   :  { %131 = vrot.lane.b32.xlu1 %v2345_v3, %s2290_s13  ;;  %127 = vrot.lane.b32.xlu0 %v2350_v4, %s2290_s13  ;;  %4355 = vst [vmem:[#allocation10_spill] sm:$0xff] %v2376_v8 }
   0xb   :  { %135 = vrot.lane.b32.xlu2 %v2355_v5, %s2290_s13  ;;  %4356 = vst [vmem:[#allocation11_spill] sm:$0xff] %v2387_v9 }
   0xc   :  { %4357 = vst [vmem:[#allocation12_spill] sm:$0xff] %v2392_v10 }
   0xd   :  { %4358 = vst [vmem:[#allocation13_spill] sm:$0xff] %v2397_v11 }
   0xe   :  { %4359 = vst [vmem:[#allocation14_spill] sm:$0xff] %v2408_v12 }
   0xf   :  { %4360 = vst [vmem:[#allocation15_spill] sm:$0xff] %v2413_v13 }
  0x10   :  { %4361 = vst [vmem:[#allocation16_spill] sm:$0xff] %v2418_v14 }
  0x11   :  { %4362 = vst [vmem:[#allocation17_spill] sm:$0xff] %v2429_v15 }
  0x12   :  { %137 = vrot.lane.b32.xlu0 %v2366_v6, %s2290_s13  ;;  %139 = vrot.lane.b32.xlu1 %v2371_v7, %s2290_s13  ;;  %4368 = vst [vmem:[#allocation23_spill] sm:$0xff] %v2497_v61 }
  0x13   :  { %141 = vrot.lane.b32.xlu2 %v2376_v8, %s2290_s13 }
  0x1a   :  { %143 = vrot.lane.b32.xlu0 %v2387_v9, %s2290_s13  ;;  %145 = vrot.lane.b32.xlu1 %v2392_v10, %s2290_s13 }
  0x1b   :  { %147 = vrot.lane.b32.xlu2 %v2397_v11, %s2290_s13 }
  0x22   :  { %149 = vrot.lane.b32.xlu0 %v2408_v12, %s2290_s13  ;;  %151 = vrot.lane.b32.xlu1 %v2413_v13, %s2290_s13 }
  0x23   :  { %153 = vrot.lane.b32.xlu2 %v2418_v14, %s2290_s13 }
  0x2a   :  { %155 = vrot.lane.b32.xlu0 %v2429_v15, %s2290_s13 }
  0x5d   :  { %v134_v16 = vpop.permute.xlu2 %133 }
  0x5e   :  { %v177_v32 = vsub.f32 %v2338_v2, %v134_v16 }
  0x65   :  { %v136_v17 = vpop.permute.xlu2 %135 }
  0x66   :  { %v178_v22 = vsub.f32 %v2355_v5, %v136_v17 }
  0x6d   :  { %v142_v23 = vpop.permute.xlu2 %141 }
  0x6e   :  { %v2444_v28 = vsub.f32 %v2376_v8, %v142_v23  ;;  %v2522_v23 = vadd.s32 40, %v2497_v61 }
  0x70   :  { %4376 = vst [vmem:[#allocation31_spill] sm:$0xff] %v2522_v23 }
  0x74   :  { %v130_v18 = vpop.permute.xlu1 %129  ;;  %v126_v19 = vpop.permute.xlu0 %125 }
  0x75   :  { %v175_v20 = vsub.f32 %v2324_v0, %v130_v18  ;;  %v173_v21 = vsub.f32 %v2329_v1, %v126_v19  ;;  %v148_v33 = vpop.permute.xlu2 %147  ;;  %v2506_v18 = vadd.s32 8, %v2497_v61  ;;  %v2509_v19 = vadd.s32 16, %v2497_v61 }
  0x76   :  { %v2456_v34 = vsub.f32 %v2397_v11, %v148_v33  ;;  %v2554_v33 = vadd.s32 104, %v2497_v61 }
  0x77   :  { %209 = vrot.lane.b32.xlu0 %v175_v20, %s2291_s15  ;;  %205 = vrot.lane.b32.xlu1 %v173_v21, %s2291_s15  ;;  %4372 = vst [vmem:[#allocation27_spill] sm:$0xff] %v2506_v18 }
  0x78   :  { %4373 = vst [vmem:[#allocation28_spill] sm:$0xff] %v2509_v19 }
  0x79   :  { %4384 = vst [vmem:[#allocation39_spill] sm:$0xff] %v2554_v33 }
  0x7c   :  { %v132_v24 = vpop.permute.xlu1 %131  ;;  %v128_v25 = vpop.permute.xlu0 %127 }
  0x7d   :  { %v176_v26 = vsub.f32 %v2345_v3, %v132_v24  ;;  %v174_v27 = vsub.f32 %v2350_v4, %v128_v25  ;;  %v154_v39 = vpop.permute.xlu2 %153  ;;  %v2525_v24 = vadd.s32 48, %v2497_v61  ;;  %v2528_v25 = vadd.s32 56, %v2497_v61 }
  0x7e   :  { %v2468_v40 = vsub.f32 %v2418_v14, %v154_v39 }
  0x7f   :  { %215 = vrot.lane.b32.xlu0 %v178_v22, %s2291_s15  ;;  %211 = vrot.lane.b32.xlu1 %v176_v26, %s2291_s15  ;;  %4377 = vst [vmem:[#allocation32_spill] sm:$0xff] %v2525_v24 }
  0x80   :  { %207 = vrot.lane.b32.xlu2 %v174_v27, %s2291_s15  ;;  %4378 = vst [vmem:[#allocation33_spill] sm:$0xff] %v2528_v25 }
  0x84   :  { %v138_v29 = vpop.permute.xlu0 %137  ;;  %v140_v31 = vpop.permute.xlu1 %139 }
  0x85   :  { %v2447_v30 = vsub.f32 %v2366_v6, %v138_v29  ;;  %v180_v35 = vsub.f32 %v2371_v7, %v140_v31  ;;  %v2541_v29 = vadd.s32 80, %v2497_v61  ;;  %v2544_v31 = vadd.s32 88, %v2497_v61 }
  0x87   :  { %221 = vrot.lane.b32.xlu0 %v2444_v28, %s2291_s15  ;;  %217 = vrot.lane.b32.xlu1 %v2447_v30, %s2291_s15  ;;  %4381 = vst [vmem:[#allocation36_spill] sm:$0xff] %v2541_v29 }
  0x88   :  { %213 = vrot.lane.b32.xlu2 %v177_v32, %s2291_s15  ;;  %4382 = vst [vmem:[#allocation37_spill] sm:$0xff] %v2544_v31 }
  0x8c   :  { %v144_v36 = vpop.permute.xlu0 %143  ;;  %v146_v38 = vpop.permute.xlu1 %145 }
  0x8d   :  { %v2460_v37 = vsub.f32 %v2387_v9, %v144_v36  ;;  %v183_v41 = vsub.f32 %v2392_v10, %v146_v38  ;;  %v2560_v36 = vadd.s32 120, %v2497_v61 }
  0x8f   :  { %227 = vrot.lane.b32.xlu0 %v2456_v34, %s2291_s15  ;;  %223 = vrot.lane.b32.xlu1 %v2460_v37, %s2291_s15  ;;  %4386 = vst [vmem:[#allocation41_spill] sm:$0xff] %v2560_v36 }
  0x90   :  { %219 = vrot.lane.b32.xlu2 %v180_v35, %s2291_s15 }
  0x94   :  { %v150_v42 = vpop.permute.xlu0 %149  ;;  %v152_v44 = vpop.permute.xlu1 %151 }
  0x95   :  { %v2472_v43 = vsub.f32 %v2408_v12, %v150_v42  ;;  %v186_v45 = vsub.f32 %v2413_v13, %v152_v44 }
  0x97   :  { %233 = vrot.lane.b32.xlu0 %v2468_v40, %s2291_s15  ;;  %229 = vrot.lane.b32.xlu1 %v2472_v43, %s2291_s15 }
  0x98   :  { %225 = vrot.lane.b32.xlu2 %v183_v41, %s2291_s15 }
  0x9c   :  { %v156_v46 = vpop.permute.xlu0 %155 }
  0x9d   :  { %v2481_v47 = vsub.f32 %v2429_v15, %v156_v46 }
  0x9f   :  { %235 = vrot.lane.b32.xlu1 %v2481_v47, %s2291_s15 }
  0xa0   :  { %231 = vrot.lane.b32.xlu2 %v186_v45, %s2291_s15 }
  0xda   :  { %v208_v48 = vpop.permute.xlu2 %207 }
  0xdb   :  { %v2486_v49 = vmul.f32 %v208_v48, %v174_v27  ;;  %v2538_v27 = vadd.s32 72, %v2497_v61 }
  0xdd   :  { %4363 = vst [vmem:[#allocation18_spill] sm:$0xff] %v2486_v49 }
  0xde   :  { %4380 = vst [vmem:[#allocation35_spill] sm:$0xff] %v2538_v27 }
  0xe2   :  { %v214_v50 = vpop.permute.xlu2 %213 }
  0xe3   :  { %v2488_v51 = vmul.f32 %v214_v50, %v177_v32  ;;  %v2551_v32 = vadd.s32 96, %v2497_v61 }
  0xe5   :  { %4364 = vst [vmem:[#allocation19_spill] sm:$0xff] %v2488_v51 }
  0xe6   :  { %4383 = vst [vmem:[#allocation38_spill] sm:$0xff] %v2551_v32 }
  0xe9   :  { %v206_v52 = vpop.permute.xlu1 %205  ;;  %v210_v53 = vpop.permute.xlu0 %209 }
  0xea   :  { %v2490_v54 = vmul.f32 %v206_v52, %v173_v21  ;;  %v220_v55 = vpop.permute.xlu2 %219  ;;  %v2492_v56 = vmul.f32 %v210_v53, %v175_v20  ;;  %v2512_v20 = vadd.s32 24, %v2497_v61  ;;  %v2292_v21 = vmov 1.0  }
  0xeb   :  { %v2494_v57 = vmul.f32 %v220_v55, %v180_v35  ;;  %77 = vst.msk [vmem:[%s4247_s2] sm:$0xff] %vm76_vm0, %v2292_v21  ;;  %v2557_v35 = vadd.s32 112, %v2497_v61 }
  0xec   :  { %4365 = vst [vmem:[#allocation20_spill] sm:$0xff] %v2490_v54 }
  0xed   :  { %4366 = vst [vmem:[#allocation21_spill] sm:$0xff] %v2492_v56 }
  0xee   :  { %4367 = vst [vmem:[#allocation22_spill] sm:$0xff] %v2494_v57 }
  0xef   :  { %4374 = vst [vmem:[#allocation29_spill] sm:$0xff] %v2512_v20 }
  0xf0   :  { %78 = vst.msk [vmem:[%s4247_s2 + $0x8] sm:$0xff] %vm76_vm0, %v2292_v21 }
  0xf1   :  { %v212_v59 = vpop.permute.xlu1 %211  ;;  %v216_v60 = vpop.permute.xlu0 %215  ;;  %79 = vst.msk [vmem:[%s4247_s2 + $0x10] sm:$0xff] %vm76_vm0, %v2292_v21 }
  0xf2   :  { %v2499_v62 = vmul.f32 %v212_v59, %v176_v26  ;;  %v226_v63 = vpop.permute.xlu2 %225  ;;  %v2501_v16 = vmul.f32 %v216_v60, %v178_v22  ;;  %v2519_v22 = vadd.s32 32, %v2497_v61  ;;  %v2535_v26 = vadd.s32 64, %v2497_v61  ;;  %4385 = vst [vmem:[#allocation40_spill] sm:$0xff] %v2557_v35 }
  0xf3   :  { %v2503_v17 = vmul.f32 %v226_v63, %v183_v41  ;;  %80 = vst.msk [vmem:[%s4247_s2 + $0x18] sm:$0xff] %vm76_vm0, %v2292_v21 }
  0xf4   :  { %4369 = vst [vmem:[#allocation24_spill] sm:$0xff] %v2499_v62 }
  0xf5   :  { %4370 = vst [vmem:[#allocation25_spill] sm:$0xff] %v2501_v16 }
  0xf6   :  { %4371 = vst [vmem:[#allocation26_spill] sm:$0xff] %v2503_v17 }
  0xf7   :  { %4375 = vst [vmem:[#allocation30_spill] sm:$0xff] %v2519_v22 }
  0xf8   :  { %4379 = vst [vmem:[#allocation34_spill] sm:$0xff] %v2535_v26 }
  0xf9   :  { %81 = vst.msk [vmem:[%s4247_s2 + $0x20] sm:$0xff] %vm76_vm0, %v2292_v21  ;;  %v218_v38 = vpop.permute.xlu1 %217  ;;  %v222_v39 = vpop.permute.xlu0 %221 }
  0xfa   :  { %82 = vst.msk [vmem:[%s4247_s2 + $0x28] sm:$0xff] %vm76_vm0, %v2292_v21  ;;  %v232_v41 = vpop.permute.xlu2 %231  ;;  %v2579_v42 = vmul.f32 %v218_v38, %v2447_v30  ;;  %v2582_v44 = vmul.f32 %v222_v39, %v2444_v28 }
  0xfb   :  { %83 = vst.msk [vmem:[%s4247_s2 + $0x30] sm:$0xff] %vm76_vm0, %v2292_v21  ;;  %v2588_v46 = vmul.f32 %v232_v41, %v186_v45 }
  0xfc   :  { %4387 = vst [vmem:[#allocation42_spill] sm:$0xff] %v2579_v42 }
  0xfd   :  { %4388 = vst [vmem:[#allocation43_spill] sm:$0xff] %v2582_v44 }
  0xfe   :  { %84 = vst.msk [vmem:[%s4247_s2 + $0x38] sm:$0xff] %vm76_vm0, %v2292_v21 }
  0xff   :  { %4389 = vst [vmem:[#allocation44_spill] sm:$0xff] %v2588_v46 }
 0x100   :  { %85 = vst.msk [vmem:[%s4247_s2 + $0x40] sm:$0xff] %vm76_vm0, %v2292_v21 }
 0x101   :  { %86 = vst.msk [vmem:[%s4247_s2 + $0x48] sm:$0xff] %vm76_vm0, %v2292_v21  ;;  %v224_v28 = vpop.permute.xlu1 %223  ;;  %v228_v30 = vpop.permute.xlu0 %227 }
 0x102   :  { %87 = vst.msk [vmem:[%s4247_s2 + $0x50] sm:$0xff] %vm76_vm0, %v2292_v21  ;;  %v2619_v45 = vmul.f32 %v224_v28, %v2460_v37  ;;  %v2622_v48 = vmul.f32 %v228_v30, %v2456_v34 }
 0x103   :  { %88 = vst.msk [vmem:[%s4247_s2 + $0x58] sm:$0xff] %vm76_vm0, %v2292_v21 }
 0x104   :  { %89 = vst.msk [vmem:[%s4247_s2 + $0x60] sm:$0xff] %vm76_vm0, %v2292_v21 }
 0x105   :  { %90 = vst.msk [vmem:[%s4247_s2 + $0x68] sm:$0xff] %vm76_vm0, %v2292_v21 }
 0x106   :  { %91 = vst.msk [vmem:[%s4247_s2 + $0x70] sm:$0xff] %vm76_vm0, %v2292_v21 }
 0x107   :  { %4390 = vst [vmem:[#allocation45_spill] sm:$0xff] %v2619_v45 }
 0x108   :  { %4391 = vst [vmem:[#allocation46_spill] sm:$0xff] %v2622_v48 }
 0x109   :  { %92 = vst.msk [vmem:[%s4247_s2 + $0x78] sm:$0xff] %vm76_vm0, %v2292_v21  ;;  %v230_v50 = vpop.permute.xlu1 %229  ;;  %v234_v52 = vpop.permute.xlu0 %233 }
 0x10a   :  { %v2629_v53 = vmul.f32 %v230_v50, %v2472_v43  ;;  %v2632_v55 = vmul.f32 %v234_v52, %v2468_v40 }
 0x10c   :  { %4392 = vst [vmem:[#allocation47_spill] sm:$0xff] %v2629_v53 }
 0x10d   :  { %4393 = vst [vmem:[#allocation48_spill] sm:$0xff] %v2632_v55 }
 0x111   :  { %v236_v59 = vpop.permute.xlu1 %235 }
 0x112   :  { %v2635_v37 = vmul.f32 %v236_v59, %v2481_v47 }
 0x114   :  { %4394 = vst [vmem:[#allocation49_spill] sm:$0xff] %v2635_v37 }
 0x115 LB: > { %v4395_v26 = vld [vmem:[#allocation34_spill] sm:$0xff]  ;;  %v4396_v25 = vld [vmem:[#allocation33_spill] sm:$0xff]  ;;  %v4397_v23 = vld [vmem:[#allocation31_spill] sm:$0xff]  ;;  %v4249_v34 = vmov 0   ;;  %v4252_v40 = vmov 1   ;;  %v4259_v43 = vmov 3   ;;  %s2288_s19 = sphi %s2637_s19, %s274_s19  }
 0x116   : > { %v4398_v19 = vld [vmem:[#allocation28_spill] sm:$0xff]  ;;  %v4399_v18 = vld [vmem:[#allocation27_spill] sm:$0xff]  ;;  %v4403_v7 = vld [vmem:[#allocation9_spill] sm:$0xff]  ;;  %1953 = vset.pattern.permute.xlu2 %v4249_v34  ;;  %1952 = vset.pattern.permute.xlu1 %v4249_v34  ;;  %v4250_v47 = vmov 2   ;;  %s2743_s20 = sshll.u32 %s2288_s19, 3  ;;  %s2297_s27 = smov 2  }
 0x117   : > { %v4400_v13 = vld [vmem:[#allocation15_spill] sm:$0xff]  ;;  %v4401_v10 = vld [vmem:[#allocation12_spill] sm:$0xff]  ;;  %v4404_v0 = vld [vmem:[#allocation2_spill] sm:$0xff]  ;;  %1951 = vset.pattern.permute.xlu0 %v4249_v34  ;;  %s276_s23 = scalar_lea.vmem %s4246_s1, %s2743_s20  ;;  %s1127_s26 = scalar_lea.vmem %s4245_s0, %s2743_s20 }
 0x118   : > { %v4402_v14 = vld [vmem:[#allocation16_spill] sm:$0xff]  ;;  %v4405_v11 = vld [vmem:[#allocation13_spill] sm:$0xff]  ;;  %v4406_v8 = vld [vmem:[#allocation10_spill] sm:$0xff]  ;;  %295 = vperm.xlu1 %1952, %v4404_v0   ;;  %s2299_s28 = smov 127   ;;  %s2300_s29 = smov 126  }
 0x119   : > { %v4407_v15 = vld [vmem:[#allocation17_spill] sm:$0xff]  ;;  %v4408_v12 = vld [vmem:[#allocation14_spill] sm:$0xff]  ;;  %v4409_v2 = vld [vmem:[#allocation4_spill] sm:$0xff]  ;;  %s2301_s30 = smov 125   ;;  %s2302_s3 = smov 124  }
 0x11a   : > { %v4410_v5 = vld [vmem:[#allocation7_spill] sm:$0xff]  ;;  %v4412_v3 = vld [vmem:[#allocation5_spill] sm:$0xff]  ;;  %v4414_v6 = vld [vmem:[#allocation8_spill] sm:$0xff]  ;;  %303 = vperm.xlu2 %1953, %v4409_v2   ;;  %s2303_s4 = smov 123   ;;  %s2304_s5 = smov 122  }
 0x11b   : > { %v4411_v9 = vld [vmem:[#allocation11_spill] sm:$0xff]  ;;  %v4415_v4 = vld [vmem:[#allocation6_spill] sm:$0xff]  ;;  %v4416_v56 = vld [vmem:[#allocation21_spill] sm:$0xff]  ;;  %s2305_s6 = smov 121   ;;  %s1191_s9 = scalar_lea.vmem %s4247_s2, %s2743_s20 }
 0x11c   : > { %v4413_v1 = vld [vmem:[#allocation3_spill] sm:$0xff]  ;;  %v4417_v57 = vld [vmem:[#allocation22_spill] sm:$0xff]  ;;  %v4419_v46 = vld [vmem:[#allocation44_spill] sm:$0xff]  ;;  %s274_s19 = sadd.s32 1, %s2288_s19  }
 0x11d   : > { %287 = vperm.xlu0 %1951, %v4413_v1   ;;  %v4418_v17 = vld [vmem:[#allocation26_spill] sm:$0xff]  ;;  %v4423_v54 = vld [vmem:[#allocation20_spill] sm:$0xff]  ;;  %v4424_v51 = vld [vmem:[#allocation19_spill] sm:$0xff]  ;;  %p271_p0 = scmp.ge.s32.totalorder %s274_s19, 16  }
 0x11e   : > { %v4422_v49 = vld [vmem:[#allocation18_spill] sm:$0xff]  ;;  %v4425_v62 = vld [vmem:[#allocation24_spill] sm:$0xff]  ;;  %v4427_v16 = vld [vmem:[#allocation25_spill] sm:$0xff] }
 0x11f   : > { %v4426_v42 = vld [vmem:[#allocation42_spill] sm:$0xff]  ;;  %v4428_v45 = vld [vmem:[#allocation45_spill] sm:$0xff]  ;;  %v4429_v44 = vld [vmem:[#allocation43_spill] sm:$0xff] }
 0x120   : > { %299 = vperm.xlu1 %1952, %v4412_v3   ;;  %v4430_v53 = vld [vmem:[#allocation47_spill] sm:$0xff]  ;;  %v4431_v48 = vld [vmem:[#allocation46_spill] sm:$0xff]  ;;  %v4432_v37 = vld [vmem:[#allocation49_spill] sm:$0xff] }
 0x121   : > { %v4433_v55 = vld [vmem:[#allocation48_spill] sm:$0xff]  ;;  %v4450_v32 = vld [vmem:[#allocation38_spill] sm:$0xff] }
 0x122   : > { %307 = vperm.xlu2 %1953, %v4410_v5   ;;  %v4444_v24 = vld [vmem:[#allocation32_spill] sm:$0xff] }
 0x125   : > { %291 = vperm.xlu0 %1951, %v4415_v4  }
 0x128   : > { %315 = vperm.xlu1 %1952, %v4403_v7  }
 0x12a   : > { %319 = vperm.xlu2 %1953, %v4406_v8  }
 0x12d   : > { %311 = vperm.xlu0 %1951, %v4414_v6  }
 0x130   : > { %327 = vperm.xlu1 %1952, %v4401_v10  }
 0x132   : > { %331 = vperm.xlu2 %1953, %v4405_v11  }
 0x135   : > { %323 = vperm.xlu0 %1951, %v4411_v9  }
 0x138   : > { %339 = vperm.xlu1 %1952, %v4400_v13  }
 0x13a   : > { %343 = vperm.xlu2 %1953, %v4402_v14  }
 0x13d   : > { %335 = vperm.xlu0 %1951, %v4408_v12  }
 0x140   : > { %1954 = vset.pattern.permute.xlu1 %v4252_v40 }
 0x141   : > { %368 = vperm.xlu1 %1954, %v4413_v1  }
 0x142   : > { %1955 = vset.pattern.permute.xlu2 %v4252_v40 }
 0x143   : > { %372 = vperm.xlu2 %1955, %v4415_v4  }
 0x145   : > { %347 = vperm.xlu0 %1951, %v4407_v15  }
 0x149   : > { %380 = vperm.xlu1 %1954, %v4412_v3  }
 0x14b   : > { %384 = vperm.xlu2 %1955, %v4409_v2  }
 0x14d   : > { %1959 = vset.pattern.permute.xlu0 %v4259_v43 }
 0x14e   : > { %534 = vperm.xlu0 %1959, %v4415_v4  }
 0x151   : > { %388 = vperm.xlu1 %1954, %v4410_v5  }
 0x153   : > { %392 = vperm.xlu2 %1955, %v4414_v6  }
 0x156   : > { %554 = vperm.xlu0 %1959, %v4414_v6  }
 0x159   : > { %400 = vperm.xlu1 %1954, %v4406_v8  }
 0x15b   : > { %404 = vperm.xlu2 %1955, %v4411_v9  }
 0x15e   : > { %566 = vperm.xlu0 %1959, %v4411_v9  }
 0x161   : > { %412 = vperm.xlu1 %1954, %v4405_v11  }
 0x163   : > { %416 = vperm.xlu2 %1955, %v4408_v12  }
 0x166   : > { %578 = vperm.xlu0 %1959, %v4408_v12  }
 0x169   : > { %424 = vperm.xlu1 %1954, %v4402_v14  }
 0x16b   : > { %428 = vperm.xlu2 %1955, %v4407_v15  }
 0x16e   : > { %590 = vperm.xlu0 %1959, %v4407_v15  }
 0x171   : > { %1956 = vset.pattern.permute.xlu1 %v4250_v47 }
 0x172   : > { %453 = vperm.xlu1 %1956, %v4415_v4  }
 0x173   : > { %1957 = vset.pattern.permute.xlu2 %v4250_v47 }
 0x174   : > { %v2683_v60 = vpop.permute.xlu2 %303  ;;  %457 = vperm.xlu2 %1957, %v4404_v0  }
 0x176   : > { %1961 = vset.pattern.permute.xlu0 %v4250_v47 }
 0x177   : > { %449 = vperm.xlu0 %1961, %v4413_v1  }
 0x17a   : > { %461 = vperm.xlu1 %1956, %v4412_v3  }
 0x17c   : > { %v2689_v63 = vpop.permute.xlu2 %307  ;;  %465 = vperm.xlu2 %1957, %v4409_v2  }
 0x17f   : > { %469 = vperm.xlu0 %1961, %v4410_v5  }
 0x182   : > { %473 = vperm.xlu1 %1956, %v4414_v6  }
 0x184   : > { %v2694_v21 = vpop.permute.xlu2 %319  ;;  %477 = vperm.xlu2 %1957, %v4403_v7  }
 0x187   : > { %481 = vperm.xlu0 %1961, %v4406_v8  }
 0x18a   : > { %v2704_v41 = vpop.permute.xlu1 %295  ;;  %485 = vperm.xlu1 %1956, %v4411_v9  }
 0x18c   : > { %v2699_v38 = vpop.permute.xlu2 %331  ;;  %489 = vperm.xlu2 %1957, %v4401_v10  }
 0x18f   : > { %v2702_v39 = vpop.permute.xlu0 %287  ;;  %493 = vperm.xlu0 %1961, %v4405_v11  }
 0x192   : > { %v2713_v50 = vpop.permute.xlu1 %299  ;;  %497 = vperm.xlu1 %1956, %v4408_v12  }
 0x194   : > { %v2708_v28 = vpop.permute.xlu2 %343  ;;  %501 = vperm.xlu2 %1957, %v4400_v13  }
 0x197   : > { %v2711_v30 = vpop.permute.xlu0 %291  ;;  %505 = vperm.xlu0 %1961, %v4402_v14  }
 0x19a   : > { %v2720_v59 = vpop.permute.xlu1 %315  ;;  %509 = vperm.xlu1 %1956, %v4407_v15  }
 0x19c   : > { %1958 = vset.pattern.permute.xlu2 %v4259_v43 }
 0x19d   : > { %v373_v58 = vpop.permute.xlu2 %372  ;;  %530 = vperm.xlu2 %1958, %v4413_v1  }
 0x19f   : > { %v2718_v52 = vpop.permute.xlu0 %311  ;;  %702 = vperm.xlu0 %1961, %v4416_v56  }
 0x1a2   : > { %v2727_v47 = vpop.permute.xlu1 %327  ;;  %1960 = vset.pattern.permute.xlu1 %v4259_v43 }
 0x1a3   : > { %538 = vperm.xlu1 %1960, %v4404_v0  }
 0x1a5   : > { %v2731_v40 = vpop.permute.xlu2 %384  ;;  %542 = vperm.xlu2 %1958, %v4412_v3  }
 0x1a7   : > { %v2725_v34 = vpop.permute.xlu0 %323  ;;  %727 = vperm.xlu0 %1961, %v4417_v57  }
 0x1aa   : > { %v2737_v6 = vpop.permute.xlu1 %339 }
 0x1ab   : > { %546 = vperm.xlu1 %1960, %v4409_v2  }
 0x1ad   : > { %v393_v1 = vpop.permute.xlu2 %392  ;;  %550 = vperm.xlu2 %1958, %v4410_v5   ;;  %v2756_v5 = vld [vmem:[%s276_s23] sm:$0xff] }
 0x1ae   : > { %v2759_v2 = vperm.slane %v2756_v5, 1  ;;  %v2762_v12 = vperm.slane %v2756_v5, 3 }
 0x1af   : > { %v2735_v4 = vpop.permute.xlu0 %335  ;;  %742 = vperm.xlu0 %1961, %v4418_v17   ;;  %v4420_v17 = vmov 1  }
 0x1b0   : > { %v433_v15 = vmax.f32 %v373_v58, %v2759_v2  ;;  %v438_v36 = vmax.f32 %v393_v1, %v2759_v2 }
 0x1b3   : > { %v2752_v9 = vpop.permute.xlu1 %368  ;;  %558 = vperm.xlu1 %1960, %v4403_v7  }
 0x1b5   : > { %v405_v3 = vpop.permute.xlu2 %404  ;;  %562 = vperm.xlu2 %1958, %v4406_v8  }
 0x1b7   : > { %v2745_v43 = vpop.permute.xlu0 %347  ;;  %757 = vperm.xlu0 %1961, %v4419_v46  }
 0x1bb   : > { %v2766_v56 = vpop.permute.xlu1 %380  ;;  %570 = vperm.xlu1 %1960, %v4401_v10  }
 0x1bd   : > { %v417_v46 = vpop.permute.xlu2 %416  ;;  %574 = vperm.xlu2 %1958, %v4405_v11  }
 0x1bf   : > { %1964 = vset.pattern.permute.xlu0 %v4420_v17 }
 0x1c0   : > { %v535_v8 = vpop.permute.xlu0 %534  ;;  %376 = vperm.xlu0 %1964, %v4404_v0  }
 0x1c1   : > { %v595_v57 = vmin.f32 %v535_v8, %v2762_v12  ;;  %v441_v8 = vmax.f32 %v405_v3, %v2759_v2  ;;  %v444_v3 = vmax.f32 %v417_v46, %v2759_v2 }
 0x1c3   : > { %v2772_v61 = vsub.f32 %v595_v57, %v433_v15  ;;  %v2775_v58 = vpop.permute.xlu1 %388  ;;  %582 = vperm.xlu1 %1960, %v4400_v13   ;;  %v4421_v57 = vmov 2  }
 0x1c5   : > { %v429_v27 = vpop.permute.xlu2 %428  ;;  %586 = vperm.xlu2 %1958, %v4402_v14  }
 0x1c6   : > { %v447_v46 = vmax.f32 %v429_v27, %v2759_v2  ;;  %v2828_v27 = vperm.slane %v2756_v5, 2 }
 0x1c8   : > { %v555_v17 = vpop.permute.xlu0 %554  ;;  %396 = vperm.xlu0 %1964, %v4403_v7  }
 0x1c9   : > { %v600_v11 = vmin.f32 %v555_v17, %v2762_v12 }
 0x1cb   : > { %v2781_v29 = vsub.f32 %v600_v11, %v438_v36  ;;  %v2784_v15 = vpop.permute.xlu1 %400  ;;  %1962 = vset.pattern.permute.xlu1 %v4421_v57 }
 0x1cc   : > { %692 = vperm.xlu1 %1962, %v4423_v54  }
 0x1cd   : > { %1963 = vset.pattern.permute.xlu2 %v4421_v57 }
 0x1ce   : > { %v2788_v0 = vpop.permute.xlu2 %457  ;;  %697 = vperm.xlu2 %1963, %v4422_v49  }
 0x1d0   : > { %v567_v1 = vpop.permute.xlu0 %566  ;;  %408 = vperm.xlu0 %1964, %v4401_v10  }
 0x1d1   : > { %v603_v7 = vmin.f32 %v567_v1, %v2762_v12 }
 0x1d3   : > { %v2794_v11 = vsub.f32 %v603_v7, %v441_v8  ;;  %v2797_v36 = vpop.permute.xlu1 %412  ;;  %v2811_v7 = vld [vmem:[%s1127_s26] sm:$0xff] }
 0x1d4   : > { %707 = vperm.xlu1 %1962, %v4425_v62  }
 0x1d6   : > { %v2799_v14 = vpop.permute.xlu2 %465  ;;  %712 = vperm.xlu2 %1963, %v4424_v51  }
 0x1d8   : > { %v579_v17 = vpop.permute.xlu0 %578  ;;  %420 = vperm.xlu0 %1964, %v4400_v13  }
 0x1d9   : > { %v606_v22 = vmin.f32 %v579_v17, %v2762_v12 }
 0x1db   : > { %v2805_v1 = vsub.f32 %v606_v22, %v444_v3  ;;  %v2814_v8 = vpop.permute.xlu1 %424  ;;  %v2825_v3 = vperm.slane %v2756_v5, 0 }
 0x1dc   : > { %717 = vperm.xlu1 %1962, %v4427_v16  }
 0x1dd   : > { %v361_v51 = vmax.f32 %v2727_v47, %v2825_v3 }
 0x1de   : > { %v2816_v13 = vpop.permute.xlu2 %477  ;;  %722 = vperm.xlu2 %1963, %v4426_v42  }
 0x1e0   : > { %v591_v10 = vpop.permute.xlu0 %590  ;;  %1130 = vrot.lane.b32.xlu0 %v2811_v7, %s2297_s27 }
 0x1e1   : > { %v609_v17 = vmin.f32 %v591_v10, %v2762_v12 }
 0x1e3   : > { %v2822_v22 = vsub.f32 %v609_v17, %v447_v46  ;;  %v351_v46 = vmax.f32 %v2702_v39, %v2825_v3  ;;  %v352_v17 = vmax.f32 %v2711_v30, %v2825_v3  ;;  %v364_v39 = vmax.f32 %v2737_v6, %v2825_v3 }
 0x1e4   : > { %v454_v42 = vpop.permute.xlu1 %453  ;;  %732 = vperm.xlu1 %1962, %v4429_v44  }
 0x1e5   : > { %v514_v54 = vmin.f32 %v454_v42, %v2828_v27 }
 0x1e6   : > { %v490_v49 = vpop.permute.xlu2 %489  ;;  %737 = vperm.xlu2 %1963, %v4428_v45  }
 0x1e7   : > { %v523_v10 = vmin.f32 %v490_v49, %v2828_v27  ;;  %v611_v20 = vsub.f32 %v514_v54, %v352_v17  ;;  %v659_v49 = vmax.f32 %v2772_v61, 0.0  ;;  %v359_v54 = vmax.f32 %v2694_v21, %v2825_v3 }
 0x1e8   : > { %1145 = vperm.xlu0 %1964, %v2811_v7   ;;  %v432_v61 = vmax.f32 %v2752_v9, %v2759_v2  ;;  %v664_v17 = vmax.f32 %v2781_v29, 0.0 }
 0x1e9   : > { %v450_v16 = vpop.permute.xlu0 %449  ;;  %v2842_v62 = vsub.f32 %v523_v10, %v361_v51  ;;  %v627_v35 = vmax.f32 %v611_v20, 0.0  ;;  %v357_v20 = vmax.f32 %v2718_v52, %v2825_v3 }
 0x1ea   : > { %v513_v47 = vmin.f32 %v450_v16, %v2828_v27 }
 0x1eb   : > { %v2845_v31 = vmul.f32 %v659_v49, %v627_v35 }
 0x1ec   : > { %v610_v45 = vsub.f32 %v513_v47, %v351_v46  ;;  %v462_v42 = vpop.permute.xlu1 %461  ;;  %747 = vperm.xlu1 %1962, %v4431_v48  }
 0x1ee   : > { %v502_v33 = vpop.permute.xlu2 %501  ;;  %752 = vperm.xlu2 %1963, %v4430_v53   ;;  %v626_v49 = vmax.f32 %v610_v45, 0.0  ;;  %v360_v45 = vmax.f32 %v2725_v34, %v2825_v3 }
 0x1ef   : > { %v526_v30 = vmin.f32 %v502_v33, %v2828_v27 }
 0x1f0   : > { %2247 = vset.pattern.permute.xlu0 %v4421_v57 }
 0x1f1   : > { %v470_v44 = vpop.permute.xlu0 %469  ;;  %v2853_v51 = vsub.f32 %v526_v30, %v364_v39  ;;  %v516_v39 = vmin.f32 %v462_v42, %v2828_v27  ;;  %v362_v30 = vmax.f32 %v2699_v38, %v2825_v3 }
 0x1f4   : > { %v474_v6 = vpop.permute.xlu1 %473  ;;  %762 = vperm.xlu1 %1962, %v4433_v55  }
 0x1f5   : > { %v519_v33 = vmin.f32 %v474_v6, %v2828_v27 }
 0x1f6   : > { %767 = vperm.xlu2 %1963, %v4432_v37  }
 0x1f7   : > { %v531_v57 = vpop.permute.xlu2 %530  ;;  %v616_v21 = vsub.f32 %v519_v33, %v357_v20  ;;  %v4434_v20 = vmov 0  }
 0x1f8   : > { %v594_v10 = vmin.f32 %v531_v57, %v2762_v12 }
 0x1f9   : > { %v482_v16 = vpop.permute.xlu0 %481  ;;  %v632_v47 = vmax.f32 %v616_v21, 0.0 }
 0x1fa   : > { %v521_v35 = vmin.f32 %v482_v16, %v2828_v27  ;;  %v642_v9 = vsub.f32 %v594_v10, %v432_v61  ;;  %v354_v16 = vmax.f32 %v2713_v50, %v2825_v3 }
 0x1fb   : > { %v2872_v6 = vmul.f32 %v664_v17, %v632_v47  ;;  %v356_v47 = vmax.f32 %v2689_v63, %v2825_v3 }
 0x1fc   : > { %v2866_v46 = vsub.f32 %v521_v35, %v359_v54  ;;  %v658_v52 = vmax.f32 %v642_v9, 0.0  ;;  %v435_v54 = vmax.f32 %v2766_v56, %v2759_v2  ;;  %v486_v61 = vpop.permute.xlu1 %485  ;;  %v613_v50 = vsub.f32 %v516_v39, %v354_v16 }
 0x1fd   : > { %v522_v42 = vmin.f32 %v486_v61, %v2828_v27  ;;  %v667_v9 = vmax.f32 %v2794_v11, 0.0  ;;  %v437_v39 = vmax.f32 %v2775_v58, %v2759_v2  ;;  %v363_v11 = vmax.f32 %v2735_v4, %v2825_v3 }
 0x1fe   : > { %1965 = vset.pattern.permute.xlu2 %v4434_v20  ;;  %v2879_v33 = vmul.f32 %v658_v52, %v626_v49  ;;  %v629_v34 = vmax.f32 %v613_v50, 0.0  ;;  %v518_v49 = vmin.f32 %v470_v44, %v2828_v27  ;;  %v365_v20 = vmax.f32 %v2708_v28, %v2825_v3 }
 0x1ff   : > { %v543_v35 = vpop.permute.xlu2 %542  ;;  %1140 = vperm.xlu2 %1965, %v2811_v7   ;;  %v619_v56 = vsub.f32 %v522_v42, %v360_v45  ;;  %v4435_v45 = vmov 3   ;;  %v670_v50 = vmax.f32 %v2805_v1, 0.0 }
 0x200   : > { %v597_v57 = vmin.f32 %v543_v35, %v2762_v12  ;;  %v615_v28 = vsub.f32 %v518_v49, %v356_v47  ;;  %v366_v47 = vmax.f32 %v2745_v43, %v2825_v3 }
 0x201   : > { %v494_v29 = vpop.permute.xlu0 %493  ;;  %v635_v17 = vmax.f32 %v619_v56, 0.0 }
 0x202   : > { %v524_v38 = vmin.f32 %v494_v29, %v2828_v27  ;;  %v645_v21 = vsub.f32 %v597_v57, %v435_v54  ;;  %v631_v56 = vmax.f32 %v615_v28, 0.0 }
 0x203   : > { %v2893_v61 = vmul.f32 %v667_v9, %v635_v17 }
 0x204   : > { %v621_v10 = vsub.f32 %v524_v38, %v362_v30  ;;  %v661_v52 = vmax.f32 %v645_v21, 0.0  ;;  %v498_v30 = vpop.permute.xlu1 %497 }
 0x205   : > { %v525_v63 = vmin.f32 %v498_v30, %v2828_v27 }
 0x206   : > { %v2897_v54 = vmul.f32 %v661_v52, %v629_v34 }
 0x207   : > { %v551_v29 = vpop.permute.xlu2 %550  ;;  %1966 = vset.pattern.permute.xlu2 %v4435_v45  ;;  %v622_v58 = vsub.f32 %v525_v63, %v363_v11  ;;  %v634_v63 = vmax.f32 %v2866_v46, 0.0  ;;  %v355_v46 = vmax.f32 %v2683_v60, %v2825_v3  ;;  %v446_v60 = vmax.f32 %v2814_v8, %v2759_v2 }
 0x208   : > { %v599_v42 = vmin.f32 %v551_v29, %v2762_v12  ;;  %1155 = vperm.xlu2 %1966, %v2811_v7  }
 0x209   : > { %v506_v16 = vpop.permute.xlu0 %505  ;;  %v638_v57 = vmax.f32 %v622_v58, 0.0 }
 0x20a   : > { %v527_v44 = vmin.f32 %v506_v16, %v2828_v27  ;;  %v647_v35 = vsub.f32 %v599_v42, %v437_v39  ;;  %v673_v16 = vmax.f32 %v2822_v22, 0.0 }
 0x20b   : > { %v2907_v21 = vmul.f32 %v670_v50, %v638_v57  ;;  %v517_v50 = vmin.f32 %v2799_v14, %v2828_v27  ;;  %v637_v57 = vmax.f32 %v621_v10, 0.0 }
 0x20c   : > { %v624_v38 = vsub.f32 %v527_v44, %v365_v20  ;;  %v663_v4 = vmax.f32 %v647_v35, 0.0  ;;  %v510_v9 = vpop.permute.xlu1 %509  ;;  %v440_v20 = vmax.f32 %v2784_v15, %v2759_v2  ;;  %v443_v15 = vmax.f32 %v2797_v36, %v2759_v2 }
 0x20d   : > { %v528_v49 = vmin.f32 %v510_v9, %v2828_v27  ;;  %v279_v35 = vrot.slane %v2756_v5, 6  ;;  %v436_v9 = vmax.f32 %v2731_v40, %v2759_v2 }
 0x20e   : > { %v2911_v34 = vmul.f32 %v663_v4, %v631_v56 }
 0x20f   : > { %v563_v52 = vpop.permute.xlu2 %562  ;;  %v625_v39 = vsub.f32 %v528_v49, %v366_v47  ;;  %v281_v4 = vsub.f32 %v2756_v5, %v279_v35 }
 0x210   : > { %v602_v1 = vmin.f32 %v563_v52, %v2762_v12 }
 0x211   : > { %v2909_v17 = vpop.permute.xlu0 %702  ;;  %v641_v11 = vmax.f32 %v625_v39, 0.0  ;;  %v283_v10 = vrot.slane %v281_v4, 1 }
 0x212   : > { %v650_v30 = vsub.f32 %v602_v1, %v440_v20  ;;  %v614_v20 = vsub.f32 %v517_v50, %v355_v46  ;;  %v353_v46 = vmax.f32 %v2704_v41, %v2825_v3  ;;  %v358_v41 = vmax.f32 %v2720_v59, %v2825_v3 }
 0x213   : > { %v2921_v29 = vmul.f32 %v673_v16, %v641_v11  ;;  %v640_v16 = vmax.f32 %v624_v38, 0.0  ;;  %v515_v38 = vmin.f32 %v2788_v0, %v2828_v27  ;;  %v520_v0 = vmin.f32 %v2816_v13, %v2828_v27 }
 0x214   : > { %v666_v44 = vmax.f32 %v650_v30, 0.0  ;;  %v630_v30 = vmax.f32 %v614_v20, 0.0 }
 0x215   : > { %v539_v42 = vpop.permute.xlu1 %538  ;;  %v617_v59 = vsub.f32 %v520_v0, %v358_v41 }
 0x216   : > { %v2925_v43 = vmul.f32 %v666_v44, %v634_v63  ;;  %v285_v63 = vmul.f32 %v283_v10, %v281_v4  ;;  %v596_v50 = vmin.f32 %v539_v42, %v2762_v12 }
 0x217   : > { %v575_v28 = vpop.permute.xlu2 %574 }
 0x218   : > { %v605_v58 = vmin.f32 %v575_v28, %v2762_v12  ;;  %v2952_v35 = vperm.slane %v285_v63, 2 }
 0x219   : > { %v2923_v45 = vpop.permute.xlu0 %727 }
 0x21a   : > { %v653_v22 = vsub.f32 %v605_v58, %v443_v15  ;;  %v773_v42 = vadd.f32 %v2952_v35, %v2909_v17  ;;  %v633_v17 = vmax.f32 %v617_v59, 0.0 }
 0x21c   : > { %v669_v56 = vmax.f32 %v653_v22, 0.0 }
 0x21d   : > { %v547_v52 = vpop.permute.xlu1 %546 }
 0x21e   : > { %v2940_v36 = vmul.f32 %v669_v56, %v637_v57  ;;  %v598_v14 = vmin.f32 %v547_v52, %v2762_v12 }
 0x21f   : > { %v587_v49 = vpop.permute.xlu2 %586 }
 0x220   : > { %v608_v1 = vmin.f32 %v587_v49, %v2762_v12  ;;  %v646_v5 = vsub.f32 %v598_v14, %v436_v9  ;;  %v612_v9 = vsub.f32 %v515_v38, %v353_v46  ;;  %v778_v46 = vadd.f32 %v2952_v35, %v2923_v45 }
 0x221   : > { %v2938_v47 = vpop.permute.xlu0 %742 }
 0x222   : > { %v656_v39 = vsub.f32 %v608_v1, %v446_v60  ;;  %v662_v11 = vmax.f32 %v646_v5, 0.0  ;;  %v628_v1 = vmax.f32 %v612_v9, 0.0 }
 0x224   : > { %v672_v40 = vmax.f32 %v656_v39, 0.0  ;;  %v2948_v28 = vmul.f32 %v662_v11, %v630_v30 }
 0x225   : > { %v559_v58 = vpop.permute.xlu1 %558 }
 0x226   : > { %v2950_v15 = vmul.f32 %v672_v40, %v640_v16  ;;  %v601_v10 = vmin.f32 %v559_v58, %v2762_v12 }
 0x228   : > { %v698_v8 = vpop.permute.xlu2 %697 }
 0x229   : > { %v2946_v44 = vpop.permute.xlu0 %757  ;;  %v772_v22 = vadd.f32 %v2952_v35, %v698_v8 }
 0x22b   : > { %v788_v57 = vsub.f32 %v772_v22, %v2845_v31 }
 0x22d   : > { %v571_v56 = vpop.permute.xlu1 %570  ;;  %v2964_v20 = vmax.f32 %v788_v57, 1e-09 }
 0x22f   : > { %2248 = vrcp.f32 %v2964_v20  ;;  %vm839_vm2 = vweird.f32 %v2964_v20 }
 0x230   : > { %v2962_v52 = vpop.permute.xlu2 %712 }
 0x232   : > { %v377_v4 = vpop.permute.xlu0 %376 }
 0x233   : > { %v434_v49 = vmax.f32 %v377_v4, %v2759_v2  ;;  %v604_v4 = vmin.f32 %v571_v56, %v2762_v12 }
 0x235   : > { %v644_v60 = vsub.f32 %v596_v50, %v434_v49  ;;  %v2976_v5 = vpop.permute.xlu1 %582  ;;  %v2982_v8 = vpop.eup %2248 }
 0x236   : > { %v835_v38 = vmul.f32 %v2982_v8, %v2964_v20  ;;  %vm840_vm1 = vweird.f32 %v2982_v8 }
 0x237   : > { %v660_v14 = vmax.f32 %v644_v60, 0.0  ;;  %vm3034_vm3 = vmor %vm839_vm2, %vm840_vm1 }
 0x238   : > { %v723_v63 = vpop.permute.xlu2 %722  ;;  %v836_v41 = vsub.f32 1.0, %v835_v38 }
 0x239   : > { %v2974_v39 = vmul.f32 %v660_v14, %v628_v1  ;;  %v777_v22 = vadd.f32 %v2952_v35, %v723_v63 }
 0x23a   : > { %v397_v30 = vpop.permute.xlu0 %396 }
 0x23b   : > { %v789_v16 = vsub.f32 %v773_v42, %v2974_v39  ;;  %v439_v40 = vmax.f32 %v397_v30, %v2759_v2  ;;  %v793_v14 = vsub.f32 %v777_v22, %v2872_v6 }
 0x23d   : > { %v2980_v11 = vmax.f32 %v789_v16, 1e-09  ;;  %v649_v13 = vsub.f32 %v601_v10, %v439_v40  ;;  %v3005_v16 = vmax.f32 %v793_v14, 1e-09  ;;  %v837_v40 = vmul.f32 %v2982_v8, %v836_v41 }
 0x23e   : > { %v693_v9 = vpop.permute.xlu1 %692  ;;  %v843_v14 = vand.u32 2147483647, %v2964_v20 }
 0x23f   : > { %2250 = vrcp.f32 %v2980_v11  ;;  %v665_v58 = vmax.f32 %v649_v13, 0.0  ;;  %v771_v45 = vadd.f32 %v2952_v35, %v693_v9  ;;  %v636_v13 = vmax.f32 %v2842_v62, 0.0 }
 0x240   : > { %v3008_v59 = vpop.permute.xlu2 %737  ;;  %v845_v62 = vand.u32 2147483648, %v2964_v20  ;;  %vm854_vm5 = vweird.f32 %v2980_v11  ;;  %vm844_vm6 = vcmp.eq.f32.partialorder %v843_v14, 8.507059e+37  ;;  %v607_v14 = vmin.f32 %v2976_v5, %v2762_v12 }
 0x241   : > { %v2990_v50 = vmul.f32 %v665_v58, %v633_v17  ;;  %v787_v56 = vsub.f32 %v771_v45, %v2879_v33  ;;  %v781_v17 = vadd.f32 %v2952_v35, %v2938_v47  ;;  %v4436_v58 = vlaneseq }
 0x242   : > { %v409_v57 = vpop.permute.xlu0 %408 }
 0x243   : > { %v794_v49 = vsub.f32 %v778_v46, %v2990_v50  ;;  %v442_v60 = vmax.f32 %v409_v57, %v2759_v2  ;;  %v3014_v22 = vand.u32 127, %v4436_v58  ;;  %v1077_v46 = vstv %s2743_s20 }
 0x244   : > { %v858_v58 = vand.u32 2147483647, %v2980_v11 }
 0x245   : > { %v2995_v1 = vpop.eup %2250  ;;  %v3001_v42 = vmax.f32 %v794_v49, 1e-09  ;;  %v652_v10 = vsub.f32 %v604_v4, %v442_v60  ;;  %v838_v4 = vadd.f32 %v2982_v8, %v837_v40  ;;  %v3026_v60 = vmax.f32 %v787_v56, 1e-09 }
 0x246   : > { %v850_v0 = vmul.f32 %v2995_v1, %v2980_v11  ;;  %v3031_v45 = vadd.s32 %v1077_v46, %v3014_v22  ;;  %vm855_vm4 = vweird.f32 %v2995_v1  ;;  %v846_v56 = vor.u32 1.1754944e-38, %v845_v62 }
 0x247   : > { %2252 = vrcp.f32 %v3001_v42  ;;  %v668_v63 = vmax.f32 %v652_v10, 0.0  ;;  %v842_v20 = vsel %vm3034_vm3, %v2982_v8, %v838_v4  ;;  %v860_v40 = vand.u32 2147483648, %v2980_v11  ;;  %vm3055_vm7 = vmor %vm854_vm5, %vm855_vm4 }
 0x248   : > { %v851_v30 = vsub.f32 1.0, %v850_v0  ;;  %2254 = vrcp.f32 %v3005_v16  ;;  %v935_v46 = vand.u32 2147483648, %v3001_v42  ;;  %v933_v4 = vand.u32 2147483647, %v3001_v42 }
 0x249   : > { %v3019_v57 = vmul.f32 %v668_v63, %v636_v13  ;;  %2256 = vrcp.f32 %v3026_v60  ;;  %v3047_v63 = vpop.permute.xlu1 %707  ;;  %v847_v0 = vsel %vm844_vm6, %v846_v56, %v842_v20  ;;  %v861_v49 = vor.u32 1.1754944e-38, %v860_v40 }
 0x24a   : > { %v852_v38 = vmul.f32 %v2995_v1, %v851_v30  ;;  %v421_v62 = vpop.permute.xlu0 %420  ;;  %vm929_vm9 = vweird.f32 %v3001_v42  ;;  %vm859_vm10 = vcmp.eq.f32.partialorder %v858_v58, 8.507059e+37  ;;  %v936_v53 = vor.u32 1.1754944e-38, %v935_v46 }
 0x24b   : > { %v797_v47 = vsub.f32 %v781_v17, %v3019_v57  ;;  %vm1081_vm12 = vcmp.gt.s32.totalorder %v4398_v19, %v3031_v45  ;;  %vm934_vm13 = vcmp.eq.f32.partialorder %v933_v4, 8.507059e+37  ;;  %v3078_v40 = vadd.f32 %v2952_v35, %v2962_v52 }
 0x24c   : > { %v853_v10 = vadd.f32 %v2995_v1, %v852_v38  ;;  %vm1080_vm14 = vcmp.gt.s32.totalorder %v4399_v18, %v3031_v45  ;;  %vm824_vm1 = vweird.f32 %v3026_v60 }
 0x24d   : > { %v2253_v9 = vpop.eup %2252  ;;  %v3040_v30 = vmax.f32 %v797_v47, 1e-09  ;;  %v753_v47 = vpop.permute.xlu2 %752 }
 0x24e   : > { %v925_v41 = vmul.f32 %v2253_v9, %v3001_v42  ;;  %v3049_v17 = vpop.eup %2254  ;;  %vm930_vm8 = vweird.f32 %v2253_v9  ;;  %v857_v11 = vsel %vm3055_vm7, %v2995_v1, %v853_v10  ;;  %v783_v20 = vadd.f32 %v2952_v35, %v753_v47 }
 0x24f   : > { %2258 = vrcp.f32 %v3040_v30  ;;  %v2257_v48 = vpop.eup %2256  ;;  %vm931_vm11 = vmor %vm929_vm9, %vm930_vm8  ;;  %v862_v56 = vsel %vm859_vm10, %v861_v49, %v857_v11  ;;  %v848_v10 = vmul.f32 %v847_v0, %v2845_v31  ;;  %v830_v31 = vand.u32 2147483648, %v3026_v60 }
 0x250   : > { %v926_v13 = vsub.f32 1.0, %v925_v41  ;;  %v784_v41 = vadd.f32 %v2952_v35, %v2946_v44  ;;  %v445_v44 = vmax.f32 %v421_v62, %v2759_v2  ;;  %v820_v1 = vmul.f32 %v2257_v48, %v3026_v60 }
 0x251   : > { %v799_v52 = vsub.f32 %v783_v20, %v2907_v21  ;;  %vm825_vm15 = vweird.f32 %v2257_v48  ;;  %v828_v47 = vand.u32 2147483647, %v3026_v60  ;;  %v718_v0 = vpop.permute.xlu1 %717  ;;  %v980_v11 = vand.u32 2147483648, %v3040_v30 }
 0x252   : > { %v927_v8 = vmul.f32 %v2253_v9, %v926_v13  ;;  %v910_v13 = vmul.f32 %v3049_v17, %v3005_v16  ;;  %v655_v46 = vsub.f32 %v607_v14, %v445_v44  ;;  %v4441_v14 = vmax.f32 %v2853_v51, 0.0  ;;  %vm826_vm5 = vmor %vm824_vm1, %vm825_vm15 }
 0x253   : > { %v3097_v20 = vmax.f32 %v799_v52, 1e-09  ;;  %vm1062_vm3 = vcmp.gt.f32.partialorder %v848_v10, 0.5  ;;  %vm974_vm6 = vweird.f32 %v3040_v30  ;;  %vm829_vm7 = vcmp.eq.f32.partialorder %v828_v47, 8.507059e+37 }
 0x254   : > { %v928_v37 = vadd.f32 %v2253_v9, %v927_v8  ;;  %v911_v38 = vsub.f32 1.0, %v910_v13  ;;  %v863_v8 = vmul.f32 %v862_v56, %v2974_v39  ;;  %v671_v4 = vmax.f32 %v655_v46, 0.0 }
 0x255   : > { %v2259_v42 = vpop.eup %2258  ;;  %v831_v56 = vor.u32 1.1754944e-38, %v830_v31  ;;  %v981_v60 = vor.u32 1.1754944e-38, %v980_v11  ;;  %2260 = vrcp.f32 %v3097_v20  ;;  %v920_v52 = vand.u32 2147483648, %v3005_v16 }
 0x256   : > { %v932_v5 = vsel %vm931_vm11, %v2253_v9, %v928_v37  ;;  %v970_v37 = vmul.f32 %v2259_v42, %v3040_v30  ;;  %v821_v9 = vsub.f32 1.0, %v820_v1  ;;  %v3095_v39 = vmul.f32 %v671_v4, %v4441_v14  ;;  %vm1096_vm11 = vmand %vm1062_vm3, %vm1080_vm14 }
 0x257   : > { %v937_v58 = vsel %vm934_vm13, %v936_v53, %v932_v5  ;;  %vm975_vm2 = vweird.f32 %v2259_v42  ;;  %vm1063_vm4 = vcmp.gt.f32.partialorder %v863_v8, 0.5  ;;  %v912_v51 = vmul.f32 %v3049_v17, %v911_v38 }
 0x258   : > { %v3083_v49 = vmul.f32 %v937_v58, %v2990_v50  ;;  %v971_v62 = vsub.f32 1.0, %v970_v37  ;;  %v822_v53 = vmul.f32 %v2257_v48, %v821_v9  ;;  %v978_v50 = vand.u32 2147483647, %v3040_v30  ;;  %vm976_vm8 = vmor %vm974_vm6, %vm975_vm2 }
 0x259   : > { %v800_v5 = vsub.f32 %v784_v41, %v3095_v39  ;;  %v1131_v41 = vpop.permute.xlu0 %1130  ;;  %vm1097_vm10 = vmand %vm1063_vm4, %vm1081_vm12  ;;  %v4290_v38 = vmov 0.0   ;;  %v913_v31 = vadd.f32 %v3049_v17, %v912_v51  ;;  %vm915_vm12 = vweird.f32 %v3049_v17 }
 0x25a   : > { %v972_v13 = vmul.f32 %v2259_v42, %v971_v62  ;;  %v823_v44 = vadd.f32 %v2257_v48, %v822_v53  ;;  %vm979_vm9 = vcmp.eq.f32.partialorder %v978_v50, 8.507059e+37  ;;  %v3126_v8 = vsel %vm1097_vm10, 1.0, %v4290_v38 }
 0x25b   : > { %v3102_v37 = vmax.f32 %v800_v5, 1e-09  ;;  %4442 = vst [vmem:[#allocation50_spill] sm:$0xff] %v3126_v8  ;;  %v3133_v10 = vpop.eup %2260  ;;  %vm914_vm13 = vweird.f32 %v3005_v16  ;;  %v918_v62 = vand.u32 2147483647, %v3005_v16  ;;  %v774_v53 = vadd.f32 %v2952_v35, %v3047_v63 }
 0x25c   : > { %v973_v1 = vadd.f32 %v2259_v42, %v972_v13  ;;  %v827_v58 = vsel %vm826_vm5, %v2257_v48, %v823_v44  ;;  %vm916_vm14 = vmor %vm914_vm13, %vm915_vm12  ;;  %v776_v11 = vadd.f32 %v2952_v35, %v718_v0  ;;  %v1000_v16 = vmul.f32 %v3133_v10, %v3097_v20 }
 0x25d   : > { %v832_v46 = vsel %vm829_vm7, %v831_v56, %v827_v58  ;;  %2262 = vrcp.f32 %v3102_v37  ;;  %v917_v13 = vsel %vm916_vm14, %v3049_v17, %v913_v31  ;;  %v921_v56 = vor.u32 1.1754944e-38, %v920_v52 }
 0x25e   : > { %v977_v9 = vsel %vm976_vm8, %v2259_v42, %v973_v1  ;;  %v3105_v4 = vmul.f32 %v832_v46, %v2879_v33  ;;  %v791_v33 = vsub.f32 %v3078_v40, %v2948_v28  ;;  %v3123_v42 = vsub.f32 %v2811_v7, %v1131_v41 }
 0x25f   : > { %v982_v48 = vsel %vm979_vm9, %v981_v60, %v977_v9  ;;  %v3136_v40 = vsel %vm1096_vm11, 1.0, %v4290_v38  ;;  %v792_v63 = vsub.f32 %v776_v11, %v2911_v34  ;;  %vm919_vm15 = vcmp.eq.f32.partialorder %v918_v62, 8.507059e+37 }
 0x260   : > { %v3114_v30 = vmul.f32 %v982_v48, %v3019_v57  ;;  %v733_v57 = vpop.permute.xlu1 %732  ;;  %1135 = vrot.lane.b32.xlu1 %v3123_v42, %s2299_s28  ;;  %4443 = vst [vmem:[#allocation51_spill] sm:$0xff] %v3136_v40  ;;  %v3142_v50 = vmax.f32 %v791_v33, 1e-09  ;;  %v3147_v14 = vpack.i.bf16 %v3126_v8, %v3136_v40  ;;  %v790_v0 = vsub.f32 %v774_v53, %v2897_v54 }
 0x261   : > { %v779_v1 = vadd.f32 %v2952_v35, %v733_v57  ;;  %v922_v17 = vsel %vm919_vm15, %v921_v56, %v917_v13  ;;  %v1025_v58 = vand.u32 2147483648, %v3102_v37  ;;  %v780_v51 = vadd.f32 %v2952_v35, %v3008_v59 }
 0x262   : > { %1968 = vrot.lane.b32.xlu0 %v3147_v14, %s2299_s28  ;;  %2264 = vrcp.f32 %v3142_v50  ;;  %v1023_v46 = vand.u32 2147483647, %v3102_v37  ;;  %v1001_v9 = vsub.f32 1.0, %v1000_v16  ;;  %v3163_v41 = vmax.f32 %v792_v63, 1e-09  ;;  %v768_v16 = vpop.permute.xlu2 %767 }
 0x263   : > { %v2263_v47 = vpop.eup %2262  ;;  %v795_v48 = vsub.f32 %v779_v1, %v2925_v43  ;;  %v923_v33 = vmul.f32 %v922_v17, %v2872_v6  ;;  %vm1019_vm2 = vweird.f32 %v3102_v37  ;;  %v3169_v57 = vmax.f32 %v790_v0, 1e-09 }
 0x264   : > { %v1015_v44 = vmul.f32 %v2263_v47, %v3102_v37  ;;  %vm1020_vm1 = vweird.f32 %v2263_v47  ;;  %v1026_v59 = vor.u32 1.1754944e-38, %v1025_v58  ;;  %2266 = vrcp.f32 %v3163_v41 }
 0x265   : > { %vm1021_vm3 = vmor %vm1019_vm2, %vm1020_vm1  ;;  %v796_v62 = vsub.f32 %v780_v51, %v2893_v61  ;;  %vm1024_vm4 = vcmp.eq.f32.partialorder %v1023_v46, 8.507059e+37  ;;  %v3173_v11 = vmax.f32 %v795_v48, 1e-09  ;;  %v1002_v6 = vmul.f32 %v3133_v10, %v1001_v9 }
 0x266   : > { %v1016_v5 = vsub.f32 1.0, %v1015_v44  ;;  %vm1067_vm5 = vcmp.gt.f32.partialorder %v923_v33, 0.5  ;;  %vm1085_vm6 = vcmp.gt.s32.totalorder %v4444_v24, %v3031_v45  ;;  %2268 = vrcp.f32 %v3169_v57 }
 0x267   : > { %2270 = vrcp.f32 %v3173_v11  ;;  %v3190_v56 = vmax.f32 %v796_v62, 1e-09  ;;  %vm1101_vm7 = vmand %vm1067_vm5, %vm1085_vm6  ;;  %vm1005_vm8 = vweird.f32 %v3133_v10  ;;  %v1010_v0 = vand.u32 2147483648, %v3097_v20 }
 0x268   : > { %v1017_v60 = vmul.f32 %v2263_v47, %v1016_v5  ;;  %1150 = vperm.xlu1 %1962, %v2811_v7   ;;  %v748_v52 = vpop.permute.xlu1 %747  ;;  %v3175_v13 = vpop.eup %2264  ;;  %v1003_v5 = vadd.f32 %v3133_v10, %v1002_v6  ;;  %vm1004_vm9 = vweird.f32 %v3097_v20  ;;  %v1008_v17 = vand.u32 2147483647, %v3097_v20 }
 0x269   : > { %v782_v37 = vadd.f32 %v2952_v35, %v748_v52  ;;  %v786_v58 = vadd.f32 %v2952_v35, %v768_v16  ;;  %v3206_v9 = vsel %vm1101_vm7, 1.0, %v4290_v38  ;;  %2272 = vrcp.f32 %v3190_v56  ;;  %vm3209_vm10 = vmor %vm1004_vm9, %vm1005_vm8 }
 0x26a   : > { %v1018_v31 = vadd.f32 %v2263_v47, %v1017_v60  ;;  %v2267_v63 = vpop.eup %2266  ;;  %vm1068_vm11 = vcmp.gt.f32.partialorder %v3083_v49, 0.5  ;;  %vm1086_vm12 = vcmp.gt.s32.totalorder %v4396_v25, %v3031_v45  ;;  %v1007_v20 = vsel %vm3209_vm10, %v3133_v10, %v1003_v5 }
 0x26b   : > { %v895_v1 = vmul.f32 %v2267_v63, %v3163_v41  ;;  %v903_v52 = vand.u32 2147483647, %v3163_v41  ;;  %v1011_v62 = vor.u32 1.1754944e-38, %v1010_v0  ;;  %vm900_vm13 = vweird.f32 %v2267_v63 }
 0x26c   : > { %v1022_v53 = vsel %vm1021_vm3, %v2263_v47, %v1018_v31  ;;  %v3188_v47 = vmul.f32 %v3175_v13, %v3142_v50  ;;  %v3202_v60 = vpop.eup %2268  ;;  %vm1009_vm14 = vcmp.eq.f32.partialorder %v1008_v17, 8.507059e+37  ;;  %v802_v16 = vsub.f32 %v786_v58, %v2921_v29 }
 0x26d   : > { %v1027_v7 = vsel %vm1024_vm4, %v1026_v59, %v1022_v53  ;;  %v896_v33 = vsub.f32 1.0, %v895_v1  ;;  %v2271_v31 = vpop.eup %2270  ;;  %v905_v59 = vand.u32 2147483648, %v3163_v41  ;;  %vm1084_vm15 = vcmp.gt.s32.totalorder %v4397_v23, %v3031_v45 }
 0x26e   : > { %v3182_v44 = vmul.f32 %v1027_v7, %v3095_v39  ;;  %v798_v39 = vsub.f32 %v782_v37, %v2940_v36  ;;  %v940_v7 = vmul.f32 %v2271_v31, %v3173_v11  ;;  %v865_v37 = vmul.f32 %v3202_v60, %v3169_v57 }
 0x26f   : > { %v897_v53 = vmul.f32 %v2267_v63, %v896_v33  ;;  %v1012_v10 = vsel %vm1009_vm14, %v1011_v62, %v1007_v20  ;;  %vm899_vm1 = vweird.f32 %v3163_v41  ;;  %vm904_vm3 = vcmp.eq.f32.partialorder %v903_v52, 8.507059e+37  ;;  %v3231_v48 = vpop.eup %2272  ;;  %vm1102_vm14 = vmand %vm1068_vm11, %vm1086_vm12 }
 0x270   : > { %v3200_v51 = vmax.f32 %v798_v39, 1e-09  ;;  %v763_v6 = vpop.permute.xlu1 %762  ;;  %v941_v39 = vsub.f32 1.0, %v940_v7  ;;  %vm901_vm2 = vmor %vm899_vm1, %vm900_vm13  ;;  %v906_v0 = vor.u32 1.1754944e-38, %v905_v59  ;;  %v950_v1 = vand.u32 2147483648, %v3173_v11 }
 0x271   : > { %v898_v5 = vadd.f32 %v2267_v63, %v897_v53  ;;  %v785_v17 = vadd.f32 %v2952_v35, %v763_v6  ;;  %vm945_vm4 = vweird.f32 %v2271_v31  ;;  %v948_v58 = vand.u32 2147483647, %v3173_v11 }
 0x272   : > { %2274 = vrcp.f32 %v3200_v51  ;;  %v942_v46 = vmul.f32 %v2271_v31, %v941_v39  ;;  %v3234_v20 = vmax.f32 %v802_v16, 1e-09  ;;  %vm1087_vm5 = vcmp.gt.s32.totalorder %v4395_v26, %v3031_v45 }
 0x273   : > { %v902_v33 = vsel %vm901_vm2, %v2267_v63, %v898_v5  ;;  %v801_v41 = vsub.f32 %v785_v17, %v2950_v15  ;;  %vm944_vm6 = vweird.f32 %v3173_v11  ;;  %v1013_v53 = vmul.f32 %v1012_v10, %v2907_v21 }
 0x274   : > { %v907_v62 = vsel %vm904_vm3, %v906_v0, %v902_v33  ;;  %v943_v59 = vadd.f32 %v2271_v31, %v942_v46  ;;  %v866_v7 = vsub.f32 1.0, %v865_v37  ;;  %vm946_vm7 = vmor %vm944_vm6, %vm945_vm4  ;;  %v951_v6 = vor.u32 1.1754944e-38, %v950_v1 }
 0x275   : > { %v908_v52 = vmul.f32 %v907_v62, %v2911_v34  ;;  %v3243_v16 = vmax.f32 %v801_v41, 1e-09  ;;  %vm949_vm9 = vcmp.eq.f32.partialorder %v948_v58, 8.507059e+37  ;;  %v995_v11 = vand.u32 2147483648, %v3200_v51 }
 0x276   : > { %v947_v5 = vsel %vm946_vm7, %v2271_v31, %v943_v59  ;;  %v4447_v21 = vmov 0.0   ;;  %v993_v10 = vand.u32 2147483647, %v3200_v51  ;;  %v867_v0 = vmul.f32 %v3202_v60, %v866_v7 }
 0x277   : > { %vm1066_vm8 = vcmp.gt.f32.partialorder %v908_v52, 0.5  ;;  %v952_v34 = vsel %vm949_vm9, %v951_v6, %v947_v5  ;;  %2276 = vrcp.f32 %v3243_v16  ;;  %v4448_v17 = vsub.f32 1.0, %v3188_v47  ;;  %v4452_v5 = vld [vmem:[#allocation37_spill] sm:$0xff] }
 0x278   : > { %v2275_v38 = vpop.eup %2274  ;;  %vm1100_vm10 = vmand %vm1066_vm8, %vm1084_vm15  ;;  %v953_v31 = vmul.f32 %v952_v34, %v2925_v43  ;;  %vm989_vm15 = vweird.f32 %v3200_v51  ;;  %vm884_vm11 = vweird.f32 %v3142_v50  ;;  %v955_v43 = vmul.f32 %v3231_v48, %v3190_v56 }
 0x279   : > { %v985_v63 = vmul.f32 %v2275_v38, %v3200_v51  ;;  %vm990_vm13 = vweird.f32 %v2275_v38  ;;  %v3256_v46 = vsel %vm1100_vm10, 1.0, %v4447_v21  ;;  %v882_v49 = vmul.f32 %v3175_v13, %v4448_v17 }
 0x27a   : > { %v3264_v1 = vpack.i.bf16 %v3206_v9, %v3256_v46  ;;  %vm1069_vm12 = vcmp.gt.f32.partialorder %v953_v31, 0.5  ;;  %vm991_vm1 = vmor %vm989_vm15, %vm990_vm13  ;;  %v3274_v58 = vsel %vm1102_vm14, 1.0, %v4447_v21  ;;  %vm1073_vm2 = vcmp.gt.f32.partialorder %v1013_v53, 0.5 }
 0x27b   : > { %v986_v39 = vsub.f32 1.0, %v985_v63  ;;  %4449 = vst [vmem:[#allocation52_spill] sm:$0xff] %v3274_v58  ;;  %vm1091_vm3 = vcmp.gt.s32.totalorder %v4450_v32, %v3031_v45  ;;  %vm1103_vm4 = vmand %vm1069_vm12, %vm1087_vm5  ;;  %v996_v47 = vor.u32 1.1754944e-38, %v995_v11  ;;  %2278 = vrcp.f32 %v3234_v20 }
 0x27c   : > { %1978 = vrot.lane.b32.xlu2 %v3264_v1, %s2299_s28  ;;  %v3285_v51 = vsel %vm1103_vm4, 1.0, %v4447_v21  ;;  %vm994_vm6 = vcmp.eq.f32.partialorder %v993_v10, 8.507059e+37  ;;  %v868_v52 = vadd.f32 %v3202_v60, %v867_v0  ;;  %vm870_vm7 = vweird.f32 %v3202_v60  ;;  %vm1107_vm5 = vmand %vm1073_vm2, %vm1091_vm3 }
 0x27d   : > { %v987_v37 = vmul.f32 %v2275_v38, %v986_v39  ;;  %4451 = vst [vmem:[#allocation53_spill] sm:$0xff] %v3285_v51  ;;  %v2277_v41 = vpop.eup %2276  ;;  %v3291_v63 = vpack.i.bf16 %v3285_v51, %v3274_v58  ;;  %v888_v7 = vand.u32 2147483647, %v3142_v50  ;;  %vm1090_vm8 = vcmp.gt.s32.totalorder %v4452_v5, %v3031_v45 }
 0x27e   : > { %vm885_vm9 = vweird.f32 %v3175_v13  ;;  %v956_v39 = vsub.f32 1.0, %v955_v43  ;;  %vm869_vm10 = vweird.f32 %v3169_v57  ;;  %v875_v34 = vand.u32 2147483648, %v3169_v57 }
 0x27f   : > { %v988_v33 = vadd.f32 %v2275_v38, %v987_v37  ;;  %1983 = vrot.lane.b32.xlu0 %v3291_v63, %s2299_s28  ;;  %v883_v53 = vadd.f32 %v3175_v13, %v882_v49  ;;  %vm3305_vm13 = vmor %vm869_vm10, %vm870_vm7  ;;  %v890_v37 = vand.u32 2147483648, %v3142_v50  ;;  %v3312_v10 = vsel %vm1107_vm5, 1.0, %v4447_v21 }
 0x280   : > { %4455 = vst [vmem:[#allocation54_spill] sm:$0xff] %v3312_v10  ;;  %v872_v0 = vsel %vm3305_vm13, %v3202_v60, %v868_v52  ;;  %v1040_v17 = vand.u32 2147483648, %v3243_v16  ;;  %vm1035_vm12 = vweird.f32 %v2277_v41  ;;  %vm3335_vm2 = vcmp.eq.f32.partialorder %v888_v7, 8.507059e+37  ;;  %v4461_v7 = vld [vmem:[#allocation39_spill] sm:$0xff]  ;;  %v4465_v60 = vld [vmem:[#allocation29_spill] sm:$0xff] }
 0x281   : > { %v992_v62 = vsel %vm991_vm1, %v2275_v38, %v988_v33  ;;  %v1030_v38 = vmul.f32 %v2277_v41, %v3243_v16  ;;  %v3321_v49 = vpop.eup %2278  ;;  %v1038_v33 = vand.u32 2147483647, %v3243_v16  ;;  %vm3331_vm1 = vmor %vm884_vm11, %vm885_vm9  ;;  %v876_v52 = vor.u32 1.1754944e-38, %v875_v34 }
 0x282   : > { %v997_v59 = vsel %vm994_vm6, %v996_v47, %v992_v62  ;;  %v957_v62 = vmul.f32 %v3231_v48, %v956_v39  ;;  %vm1034_vm11 = vweird.f32 %v3243_v16  ;;  %vm1092_vm4 = vcmp.gt.s32.totalorder %v4461_v7, %v3031_v45 }
 0x283   : > { %v998_v6 = vmul.f32 %v997_v59, %v2940_v36  ;;  %v873_v36 = vand.u32 2147483647, %v3169_v57  ;;  %v1031_v31 = vsub.f32 1.0, %v1030_v38  ;;  %v891_v38 = vor.u32 1.1754944e-38, %v890_v37  ;;  %vm1036_vm6 = vmor %vm1034_vm11, %vm1035_vm12 }
 0x284   : > { %v1041_v39 = vor.u32 1.1754944e-38, %v1040_v17  ;;  %vm1074_vm7 = vcmp.gt.f32.partialorder %v3182_v44, 0.5  ;;  %v1045_v34 = vmul.f32 %v3321_v49, %v3234_v20  ;;  %vm1039_vm5 = vcmp.eq.f32.partialorder %v1038_v33, 8.507059e+37 }
 0x285   : > { %vm1072_vm14 = vcmp.gt.f32.partialorder %v998_v6, 0.5  ;;  %v1032_v43 = vmul.f32 %v2277_v41, %v1031_v31  ;;  %v887_v6 = vsel %vm3331_vm1, %v3175_v13, %v883_v53  ;;  %vm874_vm3 = vcmp.eq.f32.partialorder %v873_v36, 8.507059e+37  ;;  %vm1108_vm13 = vmand %vm1074_vm7, %vm1092_vm4 }
 0x286   : > { %vm1106_vm15 = vmand %vm1072_vm14, %vm1090_vm8  ;;  %v877_v11 = vsel %vm874_vm3, %v876_v52, %v872_v0  ;;  %v892_v16 = vsel %vm3335_vm2, %v891_v38, %v887_v6  ;;  %v958_v53 = vadd.f32 %v3231_v48, %v957_v62  ;;  %vm960_vm8 = vweird.f32 %v3231_v48  ;;  %v4462_v0 = vld [vmem:[#allocation40_spill] sm:$0xff] }
 0x287   : > { %v3324_v57 = vsel %vm1106_vm15, 1.0, %v4447_v21  ;;  %v1033_v50 = vadd.f32 %v2277_v41, %v1032_v43  ;;  %v878_v31 = vmul.f32 %v877_v11, %v2897_v54  ;;  %vm1093_vm9 = vcmp.gt.s32.totalorder %v4462_v0, %v3031_v45  ;;  %v4468_v11 = vld [vmem:[#allocation36_spill] sm:$0xff]  ;;  %v4473_v0 = vld [vmem:[#allocation41_spill] sm:$0xff] }
 0x288   : > { %4456 = vst [vmem:[#allocation55_spill] sm:$0xff] %v3324_v57  ;;  %v3342_v59 = vpack.i.bf16 %v3312_v10, %v3324_v57  ;;  %vm959_vm10 = vweird.f32 %v3190_v56  ;;  %v965_v44 = vand.u32 2147483648, %v3190_v56  ;;  %v963_v54 = vand.u32 2147483647, %v3190_v56 }
 0x289   : > { %v1037_v13 = vsel %vm1036_vm6, %v2277_v41, %v1033_v50  ;;  %v893_v41 = vmul.f32 %v892_v16, %v2948_v28  ;;  %vm3369_vm14 = vmor %vm959_vm10, %vm960_vm8  ;;  %v3378_v33 = vsel %vm1108_vm13, 1.0, %v4447_v21  ;;  %vm1064_vm1 = vcmp.gt.f32.partialorder %v878_v31, 0.5  ;;  %v4470_v16 = vld [vmem:[#allocation35_spill] sm:$0xff] }
 0x28a   : > { %1993 = vrot.lane.b32.xlu2 %v3342_v59, %s2299_s28  ;;  %v1042_v36 = vsel %vm1039_vm5, %v1041_v39, %v1037_v13  ;;  %v962_v43 = vsel %vm3369_vm14, %v3231_v48, %v958_v53  ;;  %vm1082_vm2 = vcmp.gt.s32.totalorder %v4465_v60, %v3031_v45  ;;  %v966_v47 = vor.u32 1.1754944e-38, %v965_v44  ;;  %v4466_v48 = vld [vmem:[#allocation30_spill] sm:$0xff]  ;;  %v1146_v60 = vpop.permute.xlu0 %1145 }
 0x28b   : > { %v1043_v37 = vmul.f32 %v1042_v36, %v2950_v15  ;;  %v1046_v15 = vsub.f32 1.0, %v1045_v34  ;;  %vm1065_vm3 = vcmp.gt.f32.partialorder %v893_v41, 0.5  ;;  %vm1083_vm11 = vcmp.gt.s32.totalorder %v4466_v48, %v3031_v45  ;;  %vm1098_vm6 = vmand %vm1064_vm1, %vm1082_vm2 }
 0x28c   : > { %vm964_vm4 = vcmp.eq.f32.partialorder %v963_v54, 8.507059e+37  ;;  %vm1099_vm7 = vmand %vm1065_vm3, %vm1083_vm11  ;;  %v3398_v50 = vsel %vm1098_vm6, 1.0, %v4447_v21  ;;  %vm1050_vm5 = vweird.f32 %v3321_v49  ;;  %vm1089_vm8 = vcmp.gt.s32.totalorder %v4468_v11, %v3031_v45 }
 0x28d   : > { %vm1075_vm15 = vcmp.gt.f32.partialorder %v1043_v37, 0.5  ;;  %v1047_v62 = vmul.f32 %v3321_v49, %v1046_v15  ;;  %v967_v52 = vsel %vm964_vm4, %v966_v47, %v962_v43  ;;  %4467 = vst [vmem:[#allocation56_spill] sm:$0xff] %v3398_v50  ;;  %v1055_v39 = vand.u32 2147483648, %v3234_v20 }
 0x28e   : > { %vm1109_vm12 = vmand %vm1075_vm15, %vm1093_vm9  ;;  %v968_v6 = vmul.f32 %v967_v52, %v2893_v61  ;;  %v3406_v34 = vsel %vm1099_vm7, 1.0, %v4447_v21  ;;  %vm1071_vm9 = vcmp.gt.f32.partialorder %v3114_v30, 0.5  ;;  %vm1049_vm10 = vweird.f32 %v3234_v20 }
 0x28f   : > { %v3383_v28 = vsel %vm1109_vm12, 1.0, %v4447_v21  ;;  %v1048_v38 = vadd.f32 %v3321_v49, %v1047_v62  ;;  %4469 = vst [vmem:[#allocation57_spill] sm:$0xff] %v3406_v34  ;;  %v1053_v61 = vand.u32 2147483647, %v3234_v20  ;;  %vm1051_vm13 = vmor %vm1049_vm10, %vm1050_vm5  ;;  %v3415_v13 = vpack.i.bf16 %v3406_v34, %v3398_v50 }
 0x290   : > { %v3389_v56 = vpack.i.bf16 %v3383_v28, %v3378_v33  ;;  %vm1070_vm14 = vcmp.gt.f32.partialorder %v968_v6, 0.5  ;;  %vm1088_vm15 = vcmp.gt.s32.totalorder %v4470_v16, %v3031_v45  ;;  %vm1105_vm12 = vmand %vm1071_vm9, %vm1089_vm8  ;;  %v1056_v30 = vor.u32 1.1754944e-38, %v1055_v39 }
 0x291   : > { %v1052_v53 = vsel %vm1051_vm13, %v3321_v49, %v1048_v38  ;;  %vm1054_vm1 = vcmp.eq.f32.partialorder %v1053_v61, 8.507059e+37  ;;  %vm1104_vm2 = vmand %vm1070_vm14, %vm1088_vm15  ;;  %v3423_v36 = vsel %vm1105_vm12, 1.0, %v4447_v21  ;;  %vm1094_vm11 = vcmp.gt.s32.totalorder %v4473_v0, %v3031_v45 }
 0x292   : > { %2003 = vrot.lane.b32.xlu2 %v3147_v14, %s2300_s29  ;;  %1998 = vrot.lane.b32.xlu0 %v3389_v56, %s2299_s28  ;;  %v1057_v20 = vsel %vm1054_vm1, %v1056_v30, %v1052_v53  ;;  %4471 = vst [vmem:[#allocation58_spill] sm:$0xff] %v3423_v36  ;;  %v3426_v31 = vsel %vm1104_vm2, 1.0, %v4447_v21  ;;  %v1148_v48 = vmax.f32 %v1146_v60, %v2759_v2  ;;  %vm1061_vm8 = vcmp.gt.f32.partialorder %v3105_v4, 0.5 }
 0x293   : > { %4472 = vst [vmem:[#allocation59_spill] sm:$0xff] %v3426_v31  ;;  %v1058_v37 = vmul.f32 %v1057_v20, %v2921_v29  ;;  %v3433_v49 = vpack.i.bf16 %v3423_v36, %v3426_v31 }
 0x295   : > { %vm1076_vm3 = vcmp.gt.f32.partialorder %v1058_v37, 0.5 }
 0x296   : > { %vm1110_vm4 = vmand %vm1076_vm3, %vm1094_vm11 }
 0x297   : > { %v3442_v29 = vsel %vm1110_vm4, 1.0, %v4447_v21 }
 0x29a   : > { %2018 = vrot.lane.b32.xlu2 %v3291_v63, %s2300_s29  ;;  %2008 = vrot.lane.b32.xlu0 %v3415_v13, %s2300_s29 }
 0x2a2   : > { %2033 = vrot.lane.b32.xlu2 %v3389_v56, %s2300_s29  ;;  %2023 = vrot.lane.b32.xlu0 %v3433_v49, %s2300_s29 }
 0x2aa   : > { %2043 = vrot.lane.b32.xlu2 %v3415_v13, %s2301_s30  ;;  %1392 = vrot.lane.b32.xlu0 %v3442_v29, %s2300_s29 }
 0x2b2   : > { %2058 = vrot.lane.b32.xlu2 %v3433_v49, %s2301_s30  ;;  %2048 = vrot.lane.b32.xlu0 %v3264_v1, %s2301_s30 }
 0x2ba   : > { %1473 = vrot.lane.b32.xlu2 %v3442_v29, %s2301_s30  ;;  %2063 = vrot.lane.b32.xlu0 %v3342_v59, %s2301_s30 }
 0x2c2   : > { %2083 = vrot.lane.b32.xlu2 %v3264_v1, %s2302_s3  ;;  %2073 = vrot.lane.b32.xlu0 %v3147_v14, %s2302_s3 }
 0x2ca   : > { %2098 = vrot.lane.b32.xlu2 %v3342_v59, %s2302_s3  ;;  %2088 = vrot.lane.b32.xlu0 %v3291_v63, %s2302_s3 }
 0x2d2   : > { %v1136_v44 = vpop.permute.xlu1 %1135  ;;  %2108 = vrot.lane.b32.xlu2 %v3147_v14, %s2303_s4  ;;  %2103 = vrot.lane.b32.xlu0 %v3389_v56, %s2302_s3 }
 0x2d3   : > { %v1138_v41 = vmul.f32 %v1136_v44, %v3123_v42  ;;  %v1141_v42 = vpop.permute.xlu2 %1140 }
 0x2d4   : > { %v1143_v15 = vmax.f32 %v1141_v42, %v2825_v3 }
 0x2d5   : > { %1166 = vperm.xlu1 %1962, %v1138_v41  }
 0x2da   : > { %2113 = vrot.lane.b32.xlu0 %v3415_v13, %s2303_s4  ;;  %v1151_v17 = vpop.permute.xlu1 %1150 }
 0x2db   : > { %v1156_v54 = vpop.permute.xlu2 %1155  ;;  %v1153_v43 = vmin.f32 %v1151_v17, %v2828_v27 }
 0x2dc   : > { %v1158_v47 = vmin.f32 %v1156_v54, %v2762_v12 }
 0x2dd   : > { %1973 = vrot.lane.b32.xlu1 %v3415_v13, %s2299_s28  ;;  %v1159_v62 = vsub.f32 %v1153_v43, %v1143_v15 }
 0x2de   : > { %v1161_v52 = vsub.f32 %v1158_v47, %v1148_v48  ;;  %v3518_v47 = vpop.permute.xlu0 %1968 }
 0x2df   : > { %v1160_v6 = vmax.f32 %v1159_v62, 0.0  ;;  %4476 = vst [vmem:[#allocation61_spill] sm:$0xff] %v3518_v47 }
 0x2e0   : > { %v1162_v38 = vmax.f32 %v1161_v52, 0.0 }
 0x2e2   : > { %v1163_v39 = vmul.f32 %v1162_v38, %v1160_v6 }
 0x2e3   : > { %v3500_v30 = vpop.permute.xlu2 %1978 }
 0x2e5   : > { %1988 = vrot.lane.b32.xlu1 %v3433_v49, %s2299_s28 }
 0x2eb   : > { %v3507_v54 = vpop.permute.xlu2 %1993 }
 0x2ed   : > { %1311 = vrot.lane.b32.xlu1 %v3442_v29, %s2299_s28 }
 0x2f1   : > { %v3527_v62 = vpop.permute.xlu0 %1983 }
 0x2f2   : > { %4478 = vst [vmem:[#allocation63_spill] sm:$0xff] %v3527_v62 }
 0x2f5   : > { %2013 = vrot.lane.b32.xlu1 %v3264_v1, %s2300_s29 }
 0x2fd   : > { %2028 = vrot.lane.b32.xlu1 %v3342_v59, %s2300_s29 }
 0x304   : > { %v3537_v52 = vpop.permute.xlu0 %1998 }
 0x305   : > { %2038 = vrot.lane.b32.xlu1 %v3147_v14, %s2301_s30 }
 0x30d   : > { %2053 = vrot.lane.b32.xlu1 %v3291_v63, %s2301_s30 }
 0x315   : > { %2068 = vrot.lane.b32.xlu1 %v3389_v56, %s2301_s30 }
 0x31d   : > { %2078 = vrot.lane.b32.xlu1 %v3415_v13, %s2302_s3 }
 0x325   : > { %2093 = vrot.lane.b32.xlu1 %v3433_v49, %s2302_s3 }
 0x32d   : > { %1554 = vrot.lane.b32.xlu1 %v3442_v29, %s2302_s3 }
 0x335   : > { %2118 = vrot.lane.b32.xlu1 %v3264_v1, %s2303_s4 }
 0x33d   : > { %2143 = vrot.lane.b32.xlu1 %v3342_v59, %s2303_s4 }
 0x347   : > { %v1167_v11 = vpop.permute.xlu1 %1166 }
 0x348   : > { %v1169_v61 = vadd.f32 %v1167_v11, %v2952_v35  ;;  %v4474_v35 = vld [vmem:[#allocation23_spill] sm:$0xff]  ;;  %v3552_v11 = vpop.permute.xlu0 %2008 }
 0x349   : > { %vm1079_vm9 = vcmp.gt.s32.totalorder %v4474_v35, %v3031_v45  ;;  %vm1188_vm13 = vcmp.gt.s32.totalorder %v4474_v35, %v3014_v22  ;;  %v3523_v22 = vpop.permute.xlu2 %2003 }
 0x34a   : > { %v1170_v16 = vsub.f32 %v1169_v61, %v1163_v39  ;;  %vm1095_vm14 = vmand %vm1061_vm8, %vm1079_vm9  ;;  %4477 = vst [vmem:[#allocation62_spill] sm:$0xff] %v3523_v22 }
 0x34b   : > { %v3514_v60 = vsel %vm1095_vm14, 1.0, %v4447_v21 }
 0x34c   : > { %v1171_v3 = vmax.f32 %v1170_v16, 1e-09 }
 0x34e   : > { %2280 = vrcp.f32 %v1171_v3  ;;  %v1183_v37 = vand.u32 2147483648, %v1171_v3  ;;  %v1181_v0 = vand.u32 2147483647, %v1171_v3  ;;  %vm1177_vm7 = vweird.f32 %v1171_v3 }
 0x34f   : > { %v3502_v12 = vpop.permute.xlu1 %1973 }
 0x350   : > { %v1184_v41 = vor.u32 1.1754944e-38, %v1183_v37  ;;  %vm1182_vm10 = vcmp.eq.f32.partialorder %v1181_v0, 8.507059e+37  ;;  %v3564_v16 = vpop.permute.xlu0 %2023 }
 0x351   : > { %4480 = vst [vmem:[#allocation65_spill] sm:$0xff] %v3564_v16 }
 0x354   : > { %v2281_v27 = vpop.eup %2280 }
 0x355   : > { %v1173_v53 = vmul.f32 %v2281_v27, %v1171_v3  ;;  %vm1178_vm6 = vweird.f32 %v2281_v27 }
 0x356   : > { %vm1179_vm5 = vmor %vm1177_vm7, %vm1178_vm6 }
 0x357   : > { %v1174_v20 = vsub.f32 1.0, %v1173_v53  ;;  %v3511_v43 = vpop.permute.xlu1 %1988 }
 0x358   : > { %4475 = vst [vmem:[#allocation60_spill] sm:$0xff] %v3511_v43  ;;  %v3575_v53 = vpop.permute.xlu0 %1392 }
 0x359   : > { %v1175_v2 = vmul.f32 %v2281_v27, %v1174_v20  ;;  %4483 = vst [vmem:[#allocation68_spill] sm:$0xff] %v3575_v53 }
 0x35b   : > { %v1176_v44 = vadd.f32 %v2281_v27, %v1175_v2 }
 0x35d   : > { %v1180_v42 = vsel %vm1179_vm5, %v2281_v27, %v1176_v44 }
 0x35e   : > { %v1185_v17 = vsel %vm1182_vm10, %v1184_v41, %v1180_v42  ;;  %v1192_v42 = vld [vmem:[%s1191_s9] sm:$0xff] }
 0x35f   : > { %v1186_v15 = vmul.f32 %v1185_v17, %v1163_v39  ;;  %v3525_v48 = vpop.permute.xlu1 %1311 }
 0x361   : > { %vm1187_vm15 = vcmp.gt.f32.partialorder %v1186_v15, 0.5 }
 0x362   : > { %vm1189_vm12 = vmand %vm1187_vm15, %vm1188_vm13 }
 0x363   : > { %v1190_v4 = vsel %vm1189_vm12, 1.0, %v4447_v21  ;;  %v3535_v21 = vpop.permute.xlu2 %2018 }
 0x364   : > { %v2152_v45 = vpack.i.bf16 %v3514_v60, %v1190_v4  ;;  %4479 = vst [vmem:[#allocation64_spill] sm:$0xff] %v3535_v21 }
 0x366   : > { %2153 = vrot.lane.b32.xlu1 %v2152_v45, %s2301_s30  ;;  %2133 = vrot.lane.b32.xlu0 %v2152_v45, %s2300_s29 }
 0x367   : > { %2123 = vrot.lane.b32.xlu2 %v2152_v45, %s2299_s28  ;;  %v3539_v6 = vpop.permute.xlu1 %2013 }
 0x36b   : > { %v3547_v38 = vpop.permute.xlu2 %2033 }
 0x36e   : > { %2158 = vrot.lane.b32.xlu1 %v3147_v14, %s2304_s5  ;;  %2138 = vrot.lane.b32.xlu0 %v3433_v49, %s2303_s4 }
 0x36f   : > { %2128 = vrot.lane.b32.xlu2 %v3291_v63, %s2303_s4  ;;  %v3554_v39 = vpop.permute.xlu1 %2028 }
 0x373   : > { %v3560_v61 = vpop.permute.xlu2 %2043 }
 0x376   : > { %2183 = vrot.lane.b32.xlu1 %v3291_v63, %s2304_s5  ;;  %1635 = vrot.lane.b32.xlu0 %v3442_v29, %s2303_s4 }
 0x377   : > { %2148 = vrot.lane.b32.xlu2 %v3389_v56, %s2303_s4  ;;  %v3566_v3 = vpop.permute.xlu1 %2038 }
 0x378   : > { %4481 = vst [vmem:[#allocation66_spill] sm:$0xff] %v3566_v3 }
 0x37b   : > { %v3573_v27 = vpop.permute.xlu2 %2058 }
 0x37c   : > { %4482 = vst [vmem:[#allocation67_spill] sm:$0xff] %v3573_v27 }
 0x37e   : > { %2198 = vrot.lane.b32.xlu1 %v2152_v45, %s2304_s5  ;;  %2173 = vrot.lane.b32.xlu0 %v2152_v45, %s2303_s4 }
 0x37f   : > { %2163 = vrot.lane.b32.xlu2 %v2152_v45, %s2302_s3  ;;  %v3577_v20 = vpop.permute.xlu1 %2053 }
 0x380   : > { %4484 = vst [vmem:[#allocation69_spill] sm:$0xff] %v3577_v20 }
 0x383   : > { %v3581_v37 = vpop.permute.xlu2 %1473 }
 0x384   : > { %4485 = vst [vmem:[#allocation70_spill] sm:$0xff] %v3581_v37 }
 0x386   : > { %2203 = vrot.lane.b32.xlu1 %v3389_v56, %s2304_s5  ;;  %2178 = vrot.lane.b32.xlu0 %v3264_v1, %s2304_s5 }
 0x387   : > { %2168 = vrot.lane.b32.xlu2 %v3415_v13, %s2304_s5  ;;  %v3585_v2 = vpop.permute.xlu1 %2068 }
 0x38b   : > { %v3591_v0 = vpop.permute.xlu2 %2083 }
 0x38e   : > { %2218 = vrot.lane.b32.xlu1 %v3415_v13, %s2305_s6  ;;  %2193 = vrot.lane.b32.xlu0 %v3342_v59, %s2304_s5  ;;  %v3583_v13 = vpop.permute.xlu0 %2048 }
 0x38f   : > { %2188 = vrot.lane.b32.xlu2 %v3433_v49, %s2304_s5 }
 0x393   : > { %v3599_v44 = vpop.permute.xlu2 %2098 }
 0x396   : > { %2233 = vrot.lane.b32.xlu1 %v3433_v49, %s2305_s6  ;;  %2213 = vrot.lane.b32.xlu0 %v3147_v14, %s2305_s6  ;;  %v3595_v14 = vpop.permute.xlu0 %2063  ;;  %v3597_v49 = vpop.permute.xlu1 %2078 }
 0x397   : > { %2208 = vrot.lane.b32.xlu2 %v2152_v45, %s2305_s6 }
 0x39e   : > { %1797 = vrot.lane.b32.xlu1 %v3442_v29, %s2305_s6  ;;  %2228 = vrot.lane.b32.xlu0 %v3291_v63, %s2305_s6  ;;  %v3602_v41 = vpop.permute.xlu0 %2073  ;;  %v3604_v63 = vpop.permute.xlu1 %2093 }
 0x39f   : > { %1716 = vrot.lane.b32.xlu2 %v3442_v29, %s2304_s5  ;;  %4486 = vst [vmem:[#allocation71_spill] sm:$0xff] %v3602_v41 }
 0x3a0   : > { %4487 = vst [vmem:[#allocation72_spill] sm:$0xff] %v3604_v63 }
 0x3a6   : > { %2243 = vrot.lane.b32.xlu0 %v3389_v56, %s2305_s6  ;;  %v3610_v56 = vpop.permute.xlu2 %2108  ;;  %v3612_v17 = vpop.permute.xlu0 %2088 }
 0x3a7   : > { %2223 = vrot.lane.b32.xlu2 %v3264_v1, %s2305_s6  ;;  %4488 = vst [vmem:[#allocation73_spill] sm:$0xff] %v3610_v56  ;;  %v1193_v1 = vperm.slane %v1192_v42, 0  ;;  %v3614_v15 = vpop.permute.xlu1 %1554 }
 0x3a8   : > { %4489 = vst [vmem:[#allocation74_spill] sm:$0xff] %v3612_v17 }
 0x3a9   : > { %4490 = vst [vmem:[#allocation75_spill] sm:$0xff] %v3614_v15  ;;  %v1194_v45 = vmul.f32 %v1193_v1, %v1190_v4 }
 0x3ae   : > { %v3618_v7 = vpop.permute.xlu0 %2103 }
 0x3af   : > { %2238 = vrot.lane.b32.xlu2 %v3342_v59, %s2305_s6  ;;  %v1195_v59 = vsub.f32 1.0, %v1194_v45  ;;  %v3620_v18 = vpop.permute.xlu1 %2118 }
 0x3b1   : > { %v1196_v19 = vmul.f32 %v1195_v59, %v1192_v42 }
 0x3b3   : > { %v1197_v25 = vperm.slane %v1196_v19, 1 }
 0x3b6   : > { %v3625_v32 = vpop.permute.xlu0 %2113 }
 0x3b7   : > { %v3627_v35 = vpop.permute.xlu1 %2143 }
 0x3c1   : > { %v3616_v5 = vpop.permute.xlu2 %2123 }
 0x3c2   : > { %v2125_v23 = vunpack.i.l.bf16 %v3616_v5 }
 0x3c4   : > { %v1202_v26 = vmul.f32 %v2125_v23, %v1197_v25 }
 0x3c6   : > { %v1203_v55 = vsub.f32 1.0, %v1202_v26 }
 0x3c8   : > { %v1204_v1 = vmul.f32 %v1203_v55, %v1196_v19 }
 0x3c9   : > { %v3623_v24 = vpop.permute.xlu2 %2128 }
 0x3ca   : > { %4491 = vst [vmem:[#allocation76_spill] sm:$0xff] %v3623_v24  ;;  %v1205_v59 = vperm.slane %v1204_v1, 2 }
 0x3d1   : > { %v3629_v4 = vpop.permute.xlu2 %2148 }
 0x3d8   : > { %v3631_v45 = vpop.permute.xlu1 %2153  ;;  %v3633_v51 = vpop.permute.xlu0 %2133 }
 0x3d9   : > { %v2135_v42 = vunpack.i.l.bf16 %v3633_v51  ;;  %v3636_v58 = vpop.permute.xlu2 %2163  ;;  %v2155_v26 = vunpack.i.l.bf16 %v3631_v45 }
 0x3da   : > { %v2165_v50 = vunpack.i.l.bf16 %v3636_v58 }
 0x3db   : > { %v1209_v8 = vmul.f32 %v2135_v42, %v1205_v59  ;;  %v2166_v59 = vunpack.i.h.bf16 %v3636_v58 }
 0x3dd   : > { %v1210_v40 = vsub.f32 1.0, %v1209_v8 }
 0x3df   : > { %v1211_v23 = vmul.f32 %v1210_v40, %v1204_v1 }
 0x3e0   : > { %v3638_v25 = vpop.permute.xlu1 %2158  ;;  %v3640_v36 = vpop.permute.xlu0 %2138 }
 0x3e1   : > { %4492 = vst [vmem:[#allocation77_spill] sm:$0xff] %v3638_v25  ;;  %v1212_v31 = vperm.slane %v1211_v23, 3  ;;  %v3643_v19 = vpop.permute.xlu2 %2168 }
 0x3e2   : > { %4493 = vst [vmem:[#allocation78_spill] sm:$0xff] %v3640_v36 }
 0x3e3   : > { %v1216_v55 = vmul.f32 %v2155_v26, %v1212_v31 }
 0x3e5   : > { %v1217_v10 = vsub.f32 1.0, %v1216_v55 }
 0x3e7   : > { %v1218_v57 = vmul.f32 %v1217_v10, %v1211_v23 }
 0x3e8   : > { %v3645_v34 = vpop.permute.xlu0 %1635  ;;  %v3648_v42 = vpop.permute.xlu1 %2183 }
 0x3e9   : > { %v1219_v15 = vperm.slane %v1218_v57, 4  ;;  %4494 = vst [vmem:[#allocation79_spill] sm:$0xff] %v3648_v42  ;;  %v3650_v40 = vpop.permute.xlu2 %2188 }
 0x3ea   : > { %4495 = vst [vmem:[#allocation80_spill] sm:$0xff] %v3650_v40 }
 0x3eb   : > { %v1223_v8 = vmul.f32 %v2165_v50, %v1219_v15 }
 0x3ed   : > { %v1224_v1 = vsub.f32 1.0, %v1223_v8 }
 0x3ef   : > { %v1225_v10 = vmul.f32 %v1224_v1, %v1218_v57 }
 0x3f0   : > { %v3660_v15 = vpop.permute.xlu0 %2173  ;;  %v3676_v57 = vpop.permute.xlu1 %2198 }
 0x3f1   : > { %v2175_v53 = vunpack.i.l.bf16 %v3660_v15  ;;  %v1226_v26 = vperm.slane %v1225_v10, 5  ;;  %v3685_v22 = vpop.permute.xlu2 %2208  ;;  %v2200_v62 = vunpack.i.l.bf16 %v3676_v57  ;;  %v2176_v58 = vunpack.i.h.bf16 %v3660_v15 }
 0x3f2   : > { %v2210_v23 = vunpack.i.l.bf16 %v3685_v22 }
 0x3f3   : > { %v1230_v1 = vmul.f32 %v2175_v53, %v1226_v26 }
 0x3f5   : > { %v1231_v37 = vsub.f32 1.0, %v1230_v1 }
 0x3f7   : > { %v1232_v8 = vmul.f32 %v1231_v37, %v1225_v10  ;;  %v2150_v37 = vunpack.i.l.bf16 %v3629_v4 }
 0x3f8   : > { %v3715_v56 = vpop.permute.xlu1 %2203  ;;  %v3717_v31 = vpop.permute.xlu0 %2178 }
 0x3f9   : > { %v1233_v55 = vperm.slane %v1232_v8, 6 }
 0x3fb   : > { %v1237_v21 = vmul.f32 %v2200_v62, %v1233_v55  ;;  %v2126_v62 = vunpack.i.h.bf16 %v3616_v5  ;;  %v2211_v5 = vunpack.i.h.bf16 %v3685_v22  ;;  %v2206_v55 = vunpack.i.h.bf16 %v3715_v56 }
 0x3fd   : > { %v1238_v1 = vsub.f32 1.0, %v1237_v21  ;;  %v3726_v21 = vpop.permute.xlu2 %1716 }
 0x3ff   : > { %v1239_v53 = vmul.f32 %v1238_v1, %v1232_v8  ;;  %v2156_v8 = vunpack.i.h.bf16 %v3631_v45  ;;  %v2136_v1 = vunpack.i.h.bf16 %v3633_v51  ;;  %v2201_v51 = vunpack.i.h.bf16 %v3676_v57 }
 0x400   : > { %v3753_v17 = vpop.permute.xlu1 %2218  ;;  %v3758_v20 = vpop.permute.xlu0 %2193 }
 0x401   : > { %v1240_v50 = vperm.slane %v1239_v53, 7 }
 0x403   : > { %v1244_v26 = vmul.f32 %v2210_v23, %v1240_v50  ;;  %v2205_v23 = vunpack.i.l.bf16 %v3715_v56 }
 0x405   : > { %v1245_v10 = vsub.f32 1.0, %v1244_v26  ;;  %v3760_v15 = vpop.permute.xlu2 %2223 }
 0x406   : > { %4496 = vst [vmem:[#allocation81_spill] sm:$0xff] %v3760_v15 }
 0x407   : > { %v1246_v24 = vmul.f32 %v1245_v10, %v1239_v53 }
 0x409   : > { %v3766_v25 = vperm.slane %v1246_v24, 0  ;;  %v3768_v53 = vperm.slane %v1246_v24, 1  ;;  %v3770_v10 = vperm.slane %v1246_v24, 2  ;;  %v3772_v45 = vperm.slane %v1246_v24, 3 }
 0x40a   : > { %v3774_v57 = vperm.slane %v1246_v24, 4  ;;  %v3776_v41 = vperm.slane %v1246_v24, 5  ;;  %v3778_v3 = vperm.slane %v1246_v24, 6  ;;  %v3780_v22 = vperm.slane %v1246_v24, 7 }
 0x40b   : > { %v1248_v56 = vmul.f32 %v3766_v25, %v3514_v60  ;;  %v1329_v50 = vmul.f32 %v2126_v62, %v3768_v53  ;;  %v1410_v26 = vmul.f32 %v2136_v1, %v3770_v10  ;;  %v1491_v47 = vmul.f32 %v2156_v8, %v3772_v45 }
 0x40c   : > { %v1572_v40 = vmul.f32 %v2166_v59, %v3774_v57  ;;  %v1653_v36 = vmul.f32 %v2176_v58, %v3776_v41  ;;  %v1734_v42 = vmul.f32 %v2201_v51, %v3778_v3  ;;  %v1815_v63 = vmul.f32 %v2211_v5, %v3780_v22 }
 0x40d   : > { %v1345_v27 = vadd.f32 %v1329_v50, %v1248_v56  ;;  %v1261_v24 = vmul.f32 %v3766_v25, %v3378_v33  ;;  %v1262_v60 = vmul.f32 %v3766_v25, %v3383_v28  ;;  %v4497_v62 = vunpack.i.l.bf16 %v3537_v52 }
 0x40e   : > { %v4498_v59 = vunpack.i.h.bf16 %v3537_v52  ;;  %v4499_v51 = vunpack.i.l.bf16 %v3547_v38  ;;  %v4500_v5 = vunpack.i.h.bf16 %v3547_v38  ;;  %v4501_v33 = vunpack.i.l.bf16 %v3585_v2 }
 0x40f   : > { %v1342_v1 = vmul.f32 %v4497_v62, %v3768_v53  ;;  %v1426_v56 = vadd.f32 %v1410_v26, %v1345_v27  ;;  %v4502_v62 = vunpack.i.h.bf16 %v3585_v2  ;;  %v4503_v52 = vunpack.i.l.bf16 %v3618_v7 }
 0x410   : > { %v1343_v8 = vmul.f32 %v4498_v59, %v3768_v53  ;;  %v1423_v58 = vmul.f32 %v4499_v51, %v3770_v10  ;;  %v1424_v50 = vmul.f32 %v4500_v5, %v3770_v10  ;;  %v1504_v28 = vmul.f32 %v4501_v33, %v3772_v45 }
 0x411   : > { %v1358_v16 = vadd.f32 %v1342_v1, %v1261_v24  ;;  %v1505_v43 = vmul.f32 %v4502_v62, %v3772_v45  ;;  %v1585_v59 = vmul.f32 %v4503_v52, %v3774_v57  ;;  %v4504_v51 = vunpack.i.h.bf16 %v3618_v7 }
 0x412   : > { %v1359_v15 = vadd.f32 %v1343_v8, %v1262_v60  ;;  %v1666_v5 = vmul.f32 %v2150_v37, %v3776_v41  ;;  %v4505_v33 = vunpack.i.h.bf16 %v3629_v4  ;;  %v1507_v26 = vadd.f32 %v1491_v47, %v1426_v56 }
 0x413   : > { %v1586_v38 = vmul.f32 %v4504_v51, %v3774_v57  ;;  %v1439_v24 = vadd.f32 %v1423_v58, %v1358_v16  ;;  %v1747_v2 = vmul.f32 %v2205_v23, %v3778_v3  ;;  %v1748_v1 = vmul.f32 %v2206_v55, %v3778_v3 }
 0x414   : > { %v1667_v27 = vmul.f32 %v4505_v33, %v3776_v41  ;;  %v1440_v62 = vadd.f32 %v1424_v50, %v1359_v15  ;;  %v1253_v60 = vmul.f32 %v3766_v25, %v3256_v46  ;;  %v1254_v7 = vmul.f32 %v3766_v25, %v3206_v9 }
 0x415   : > { %v4506_v37 = vunpack.i.l.bf16 %v3500_v30  ;;  %v1588_v52 = vadd.f32 %v1572_v40, %v1507_v26  ;;  %v1520_v4 = vadd.f32 %v1504_v28, %v1439_v24  ;;  %v4507_v47 = vunpack.i.h.bf16 %v3500_v30 }
 0x416   : > { %v4508_v55 = vunpack.i.l.bf16 %v3539_v6  ;;  %v1521_v15 = vadd.f32 %v1505_v43, %v1440_v62  ;;  %v4509_v46 = vunpack.i.h.bf16 %v3539_v6  ;;  %v4510_v50 = vunpack.i.l.bf16 %v3583_v13 }
 0x417   : > { %v1334_v8 = vmul.f32 %v4506_v37, %v3768_v53  ;;  %v1335_v16 = vmul.f32 %v4507_v47, %v3768_v53  ;;  %v1669_v40 = vadd.f32 %v1653_v36, %v1588_v52  ;;  %v1601_v28 = vadd.f32 %v1585_v59, %v1520_v4 }
 0x418   : > { %v1415_v23 = vmul.f32 %v4508_v55, %v3770_v10  ;;  %v1416_v9 = vmul.f32 %v4509_v46, %v3770_v10  ;;  %v1496_v56 = vmul.f32 %v4510_v50, %v3772_v45  ;;  %v4511_v30 = vunpack.i.h.bf16 %v3583_v13  ;;  %v4519_v50 = vld [vmem:[#allocation70_spill] sm:$0xff] }
 0x419   : > { %v1350_v58 = vadd.f32 %v1334_v8, %v1253_v60  ;;  %v1351_v51 = vadd.f32 %v1335_v16, %v1254_v7  ;;  %v1602_v26 = vadd.f32 %v1586_v38, %v1521_v15  ;;  %v4512_v43 = vunpack.i.l.bf16 %v3591_v0 }
 0x41a   : > { %v1497_v33 = vmul.f32 %v4511_v30, %v3772_v45  ;;  %v4513_v6 = vunpack.i.h.bf16 %v3591_v0  ;;  %v1750_v37 = vadd.f32 %v1734_v42, %v1669_v40  ;;  %v1682_v8 = vadd.f32 %v1666_v5, %v1601_v28  ;;  %v1863_v0 = vld [vmem:[%s4247_s2] sm:$0xff] }
 0x41b   : > { %v1431_v24 = vadd.f32 %v1415_v23, %v1350_v58  ;;  %v1577_v62 = vmul.f32 %v4512_v43, %v3774_v57  ;;  %v1432_v47 = vadd.f32 %v1416_v9, %v1351_v51  ;;  %v4514_v36 = vunpack.i.l.bf16 %v3620_v18 }
 0x41c   : > { %v1578_v60 = vmul.f32 %v4513_v6, %v3774_v57  ;;  %v1683_v7 = vadd.f32 %v1667_v27, %v1602_v26  ;;  %v4515_v38 = vunpack.i.h.bf16 %v3620_v18  ;;  %v4516_v4 = vunpack.i.l.bf16 %v3717_v31 }
 0x41d   : > { %v1658_v59 = vmul.f32 %v4514_v36, %v3776_v41  ;;  %v1512_v13 = vadd.f32 %v1496_v56, %v1431_v24  ;;  %v1831_v42 = vadd.f32 %v1815_v63, %v1750_v37  ;;  %v3865_v5 = vadd.f32 %v1747_v2, %v1682_v8  ;;  %v4518_v63 = vld [vmem:[#allocation68_spill] sm:$0xff] }
 0x41e   : > { %v1659_v52 = vmul.f32 %v4515_v38, %v3776_v41  ;;  %v1739_v16 = vmul.f32 %v4516_v4, %v3778_v3  ;;  %v1513_v55 = vadd.f32 %v1497_v33, %v1432_v47  ;;  %v4517_v27 = vunpack.i.h.bf16 %v3717_v31  ;;  %v4521_v33 = vld [vmem:[#allocation56_spill] sm:$0xff] }
 0x41f   : > { %v3870_v15 = vadd.f32 %v1748_v1, %v1683_v7  ;;  %v1593_v18 = vadd.f32 %v1577_v62, %v1512_v13  ;;  %v1263_v58 = vmul.f32 %v3766_v25, %v3442_v29  ;;  %v1344_v46 = vmul.f32 %v3525_v48, %v3768_v53  ;;  %v4520_v1 = vld [vmem:[#allocation75_spill] sm:$0xff]  ;;  %v4522_v62 = vld [vmem:[#allocation57_spill] sm:$0xff] }
 0x420   : > { %v1740_v23 = vmul.f32 %v4517_v27, %v3778_v3  ;;  %vm1847_vm1 = vcmp.gt.f32.partialorder %v1831_v42, 0.5  ;;  %v1594_v9 = vadd.f32 %v1578_v60, %v1513_v55  ;;  %v1425_v2 = vmul.f32 %v4518_v63, %v3770_v10 }
 0x421   : > { %v1506_v56 = vmul.f32 %v4519_v50, %v3772_v45  ;;  %v1879_v40 = vsel %vm1847_vm1, 0.0, %v1863_v0  ;;  %v1674_v31 = vadd.f32 %v1658_v59, %v1593_v18  ;;  %v1360_v28 = vadd.f32 %v1344_v46, %v1263_v58 }
 0x422   : > { %v1587_v51 = vmul.f32 %v4520_v1, %v3774_v57  ;;  %1895 = vst.msk [vmem:[%s4247_s2] sm:$0xff] %vm76_vm0, %v1879_v40  ;;  %v1675_v29 = vadd.f32 %v1659_v52, %v1594_v9  ;;  %v1668_v48 = vmul.f32 %v3645_v34, %v3776_v41  ;;  %v1749_v30 = vmul.f32 %v3726_v21, %v3778_v3 }
 0x423   : > { %v1251_v26 = vmul.f32 %v3766_v25, %v4521_v33  ;;  %v1755_v24 = vadd.f32 %v1739_v16, %v1674_v31  ;;  %v1441_v43 = vadd.f32 %v1425_v2, %v1360_v28  ;;  %v1252_v6 = vmul.f32 %v3766_v25, %v4522_v62 }
 0x424   : > { %v4523_v60 = vunpack.i.l.bf16 %v3502_v12  ;;  %v3897_v8 = vadd.f32 %v1740_v23, %v1675_v29  ;;  %v4524_v34 = vunpack.i.h.bf16 %v3502_v12  ;;  %v4525_v21 = vunpack.i.l.bf16 %v3552_v11  ;;  %v4537_v29 = vld [vmem:[#allocation55_spill] sm:$0xff] }
 0x425   : > { %v4526_v59 = vunpack.i.h.bf16 %v3552_v11  ;;  %v1522_v13 = vadd.f32 %v1506_v56, %v1441_v43  ;;  %v4527_v52 = vunpack.i.l.bf16 %v3560_v61  ;;  %v4528_v16 = vunpack.i.h.bf16 %v3560_v61 }
 0x426   : > { %v1332_v37 = vmul.f32 %v4523_v60, %v3768_v53  ;;  %v1333_v47 = vmul.f32 %v4524_v34, %v3768_v53  ;;  %v1413_v36 = vmul.f32 %v4525_v21, %v3770_v10  ;;  %v4529_v42 = vunpack.i.l.bf16 %v3597_v49 }
 0x427   : > { %v1414_v7 = vmul.f32 %v4526_v59, %v3770_v10  ;;  %v1494_v4 = vmul.f32 %v4527_v52, %v3772_v45  ;;  %v1495_v0 = vmul.f32 %v4528_v16, %v3772_v45  ;;  %v4530_v27 = vunpack.i.h.bf16 %v3597_v49 }
 0x428   : > { %v1348_v38 = vadd.f32 %v1332_v37, %v1251_v26  ;;  %v1349_v12 = vadd.f32 %v1333_v47, %v1252_v6  ;;  %v1575_v55 = vmul.f32 %v4529_v42, %v3774_v57  ;;  %v4531_v23 = vunpack.i.l.bf16 %v3625_v32  ;;  %v4538_v26 = vld [vmem:[#allocation54_spill] sm:$0xff] }
 0x429   : > { %v1576_v11 = vmul.f32 %v4530_v27, %v3774_v57  ;;  %v1603_v58 = vadd.f32 %v1587_v51, %v1522_v13  ;;  %v4532_v9 = vunpack.i.h.bf16 %v3625_v32  ;;  %v4533_v63 = vunpack.i.l.bf16 %v3643_v19 }
 0x42a   : > { %v1656_v18 = vmul.f32 %v4531_v23, %v3776_v41  ;;  %v1429_v46 = vadd.f32 %v1413_v36, %v1348_v38  ;;  %v1430_v50 = vadd.f32 %v1414_v7, %v1349_v12  ;;  %v4534_v56 = vunpack.i.h.bf16 %v3643_v19 }
 0x42b   : > { %v1657_v61 = vmul.f32 %v4532_v9, %v3776_v41  ;;  %v1737_v2 = vmul.f32 %v4533_v63, %v3778_v3  ;;  %v4535_v40 = vunpack.i.l.bf16 %v3753_v17  ;;  %v4536_v28 = vunpack.i.h.bf16 %v3753_v17 }
 0x42c   : > { %v1738_v49 = vmul.f32 %v4534_v56, %v3778_v3  ;;  %v1684_v51 = vadd.f32 %v1668_v48, %v1603_v58  ;;  %v1510_v32 = vadd.f32 %v1494_v4, %v1429_v46  ;;  %v1259_v33 = vmul.f32 %v3766_v25, %v4537_v29  ;;  %v4551_v56 = vld [vmem:[#allocation81_spill] sm:$0xff] }
 0x42d   : > { %v1818_v31 = vmul.f32 %v4535_v40, %v3780_v22  ;;  %v1819_v1 = vmul.f32 %v4536_v28, %v3780_v22  ;;  %v1260_v43 = vmul.f32 %v3766_v25, %v4538_v26  ;;  %v1511_v62 = vadd.f32 %v1495_v0, %v1430_v50 }
 0x42e   : > { %v4539_v19 = vunpack.i.l.bf16 %v3507_v54  ;;  %v4540_v60 = vunpack.i.h.bf16 %v3507_v54  ;;  %v4541_v17 = vunpack.i.l.bf16 %v3554_v39  ;;  %v3951_v34 = vadd.f32 %v1749_v30, %v1684_v51 }
 0x42f   : > { %v1591_v47 = vadd.f32 %v1575_v55, %v1510_v32  ;;  %v4542_v21 = vunpack.i.h.bf16 %v3554_v39  ;;  %v4543_v59 = vunpack.i.l.bf16 %v3595_v14  ;;  %v1592_v13 = vadd.f32 %v1576_v11, %v1511_v62  ;;  %v1867_v62 = vld [vmem:[%s4247_s2 + $0x20] sm:$0xff] }
 0x430   : > { %v1340_v6 = vmul.f32 %v4539_v19, %v3768_v53  ;;  %v1341_v37 = vmul.f32 %v4540_v60, %v3768_v53  ;;  %v1421_v48 = vmul.f32 %v4541_v17, %v3770_v10  ;;  %v4544_v54 = vunpack.i.h.bf16 %v3595_v14  ;;  %v1868_v60 = vld [vmem:[%s4247_s2 + $0x28] sm:$0xff] }
 0x431   : > { %v1422_v36 = vmul.f32 %v4542_v21, %v3770_v10  ;;  %v1502_v7 = vmul.f32 %v4543_v59, %v3772_v45  ;;  %v1672_v16 = vadd.f32 %v1656_v18, %v1591_v47  ;;  %v4545_v30 = vunpack.i.l.bf16 %v3599_v44  ;;  %v2234_v18 = vpop.permute.xlu1 %2233 }
 0x432   : > { %v1356_v38 = vadd.f32 %v1340_v6, %v1259_v33  ;;  %v1357_v52 = vadd.f32 %v1341_v37, %v1260_v43  ;;  %v1503_v4 = vmul.f32 %v4544_v54, %v3772_v45  ;;  %v4546_v39 = vunpack.i.h.bf16 %v3599_v44 }
 0x433   : > { %v1583_v0 = vmul.f32 %v4545_v30, %v3774_v57  ;;  %v4547_v42 = vunpack.i.l.bf16 %v3627_v35  ;;  %v1673_v27 = vadd.f32 %v1657_v61, %v1592_v13  ;;  %v4548_v14 = vunpack.i.h.bf16 %v3627_v35 }
 0x434   : > { %v1584_v12 = vmul.f32 %v4546_v39, %v3774_v57  ;;  %v1437_v11 = vadd.f32 %v1421_v48, %v1356_v38  ;;  %v1438_v23 = vadd.f32 %v1422_v36, %v1357_v52  ;;  %v1753_v46 = vadd.f32 %v1737_v2, %v1672_v16  ;;  %v1866_v2 = vld [vmem:[%s4247_s2 + $0x18] sm:$0xff]  ;;  %v4555_v48 = vld [vmem:[#allocation58_spill] sm:$0xff] }
 0x435   : > { %v1664_v55 = vmul.f32 %v4547_v42, %v3776_v41  ;;  %v1665_v58 = vmul.f32 %v4548_v14, %v3776_v41  ;;  %v4549_v9 = vunpack.i.l.bf16 %v3758_v20  ;;  %v4550_v44 = vunpack.i.h.bf16 %v3758_v20  ;;  %v4559_v39 = vld [vmem:[#allocation65_spill] sm:$0xff] }
 0x436   : > { %v4552_v40 = vunpack.i.l.bf16 %v4551_v56  ;;  %v1754_v28 = vadd.f32 %v1738_v49, %v1673_v27  ;;  %v1518_v51 = vadd.f32 %v1502_v7, %v1437_v11  ;;  %v1519_v32 = vadd.f32 %v1503_v4, %v1438_v23  ;;  %v4556_v7 = vld [vmem:[#allocation60_spill] sm:$0xff]  ;;  %v4562_v11 = vld [vmem:[#allocation67_spill] sm:$0xff] }
 0x437   : > { %v1745_v63 = vmul.f32 %v4549_v9, %v3778_v3  ;;  %v1746_v50 = vmul.f32 %v4550_v44, %v3778_v3  ;;  %v4553_v35 = vunpack.i.h.bf16 %v4551_v56  ;;  %v1834_v33 = vadd.f32 %v1818_v31, %v1753_v46  ;;  %v4554_v31 = vld [vmem:[#allocation59_spill] sm:$0xff]  ;;  %v4565_v9 = vld [vmem:[#allocation72_spill] sm:$0xff] }
 0x438   : > { %v1820_v61 = vmul.f32 %v4552_v40, %v3780_v22  ;;  %v2236_v43 = vunpack.i.h.bf16 %v2234_v18  ;;  %v2235_v20 = vunpack.i.l.bf16 %v2234_v18  ;;  %v1835_v19 = vadd.f32 %v1819_v1, %v1754_v28  ;;  %v4568_v40 = vld [vmem:[#allocation79_spill] sm:$0xff] }
 0x439   : > { %v1821_v29 = vmul.f32 %v4553_v35, %v3780_v22  ;;  %v1599_v49 = vadd.f32 %v1583_v0, %v1518_v51  ;;  %v1600_v6 = vadd.f32 %v1584_v12, %v1519_v32  ;;  %vm1850_vm2 = vcmp.gt.f32.partialorder %v1834_v33, 0.5  ;;  %v4569_v51 = vld [vmem:[#allocation78_spill] sm:$0xff]  ;;  %v4054_v33 = vpop.permute.xlu0 %2213 }
 0x43a   : > { %v1836_v26 = vadd.f32 %v1820_v61, %v1755_v24  ;;  %v1869_v24 = vld [vmem:[%s4247_s2 + $0x30] sm:$0xff]  ;;  %v1257_v17 = vmul.f32 %v3766_v25, %v4554_v31  ;;  %v1258_v1 = vmul.f32 %v3766_v25, %v4555_v48  ;;  %vm1851_vm11 = vcmp.gt.f32.partialorder %v1835_v19, 0.5  ;;  %v4575_v48 = vld [vmem:[#allocation51_spill] sm:$0xff] }
 0x43b   : > { %v1837_v37 = vadd.f32 %v1821_v29, %v3897_v8  ;;  %v1882_v47 = vsel %vm1850_vm2, 0.0, %v1866_v2  ;;  %v1680_v21 = vadd.f32 %v1664_v55, %v1599_v49  ;;  %v1681_v36 = vadd.f32 %v1665_v58, %v1600_v6  ;;  %v4572_v19 = vld [vmem:[#allocation80_spill] sm:$0xff] }
 0x43c   : > { %vm1852_vm3 = vcmp.gt.f32.partialorder %v1836_v26, 0.5  ;;  %v1883_v59 = vsel %vm1851_vm11, 0.0, %v1867_v62  ;;  %1898 = vst.msk [vmem:[%s4247_s2 + $0x18] sm:$0xff] %vm76_vm0, %v1882_v47  ;;  %v4557_v13 = vunpack.i.l.bf16 %v4556_v7  ;;  %v4558_v16 = vunpack.i.h.bf16 %v4556_v7 }
 0x43d   : > { %vm1853_vm4 = vcmp.gt.f32.partialorder %v1837_v37, 0.5  ;;  %v1884_v8 = vsel %vm1852_vm3, 0.0, %v1868_v60  ;;  %1899 = vst.msk [vmem:[%s4247_s2 + $0x20] sm:$0xff] %vm76_vm0, %v1883_v59  ;;  %v4014_v52 = vadd.f32 %v1745_v63, %v1680_v21  ;;  %v4016_v54 = vadd.f32 %v1746_v50, %v1681_v36  ;;  %v4576_v21 = vld [vmem:[#allocation50_spill] sm:$0xff]  ;;  %v4577_v59 = vld [vmem:[#allocation61_spill] sm:$0xff] }
 0x43e   : > { %v1338_v38 = vmul.f32 %v4557_v13, %v3768_v53  ;;  %v1885_v4 = vsel %vm1853_vm4, 0.0, %v1869_v24  ;;  %v1339_v30 = vmul.f32 %v4558_v16, %v3768_v53  ;;  %1900 = vst.msk [vmem:[%s4247_s2 + $0x28] sm:$0xff] %vm76_vm0, %v1884_v8  ;;  %v4560_v12 = vunpack.i.l.bf16 %v4559_v39 }
 0x43f   : > { %v4561_v55 = vunpack.i.h.bf16 %v4559_v39  ;;  %v4563_v23 = vunpack.i.l.bf16 %v4562_v11  ;;  %1901 = vst.msk [vmem:[%s4247_s2 + $0x30] sm:$0xff] %vm76_vm0, %v1885_v4  ;;  %v4564_v18 = vunpack.i.h.bf16 %v4562_v11  ;;  %v4566_v63 = vunpack.i.l.bf16 %v4565_v9  ;;  %v4583_v39 = vld [vmem:[#allocation66_spill] sm:$0xff] }
 0x440   : > { %v1354_v0 = vadd.f32 %v1338_v38, %v1257_v17  ;;  %v1419_v42 = vmul.f32 %v4560_v12, %v3770_v10  ;;  %v1355_v58 = vadd.f32 %v1339_v30, %v1258_v1  ;;  %v4567_v50 = vunpack.i.h.bf16 %v4565_v9 }
 0x441   : > { %v1420_v27 = vmul.f32 %v4561_v55, %v3770_v10  ;;  %v1500_v14 = vmul.f32 %v4563_v23, %v3772_v45  ;;  %v1501_v46 = vmul.f32 %v4564_v18, %v3772_v45  ;;  %v1581_v44 = vmul.f32 %v4566_v63, %v3774_v57 }
 0x442   : > { %v1582_v56 = vmul.f32 %v4567_v50, %v3774_v57  ;;  %v2186_v61 = vunpack.i.h.bf16 %v4568_v40  ;;  %v1435_v28 = vadd.f32 %v1419_v42, %v1354_v0  ;;  %v4570_v32 = vunpack.i.l.bf16 %v4569_v51 }
 0x443   : > { %v4571_v29 = vunpack.i.h.bf16 %v4569_v51  ;;  %v2185_v26 = vunpack.i.l.bf16 %v4568_v40  ;;  %v1436_v62 = vadd.f32 %v1420_v27, %v1355_v58  ;;  %v4573_v49 = vunpack.i.l.bf16 %v4572_v19 }
 0x444   : > { %v1662_v35 = vmul.f32 %v4570_v32, %v3776_v41  ;;  %v4574_v60 = vunpack.i.h.bf16 %v4572_v19  ;;  %v1516_v24 = vadd.f32 %v1500_v14, %v1435_v28  ;;  %v1824_v31 = vmul.f32 %v2235_v20, %v3780_v22  ;;  %v4580_v20 = vld [vmem:[#allocation62_spill] sm:$0xff] }
 0x445   : > { %v1663_v2 = vmul.f32 %v4571_v29, %v3776_v41  ;;  %v1743_v6 = vmul.f32 %v4573_v49, %v3778_v3  ;;  %v1825_v17 = vmul.f32 %v2236_v43, %v3780_v22  ;;  %v1249_v1 = vmul.f32 %v3766_v25, %v4575_v48  ;;  %v2239_v29 = vpop.permute.xlu2 %2238 }
 0x446   : > { %v1744_v37 = vmul.f32 %v4574_v60, %v3778_v3  ;;  %v1517_v47 = vadd.f32 %v1501_v46, %v1436_v62  ;;  %v1250_v36 = vmul.f32 %v3766_v25, %v4576_v21  ;;  %v4578_v8 = vunpack.i.l.bf16 %v4577_v59  ;;  %v4586_v46 = vld [vmem:[#allocation71_spill] sm:$0xff]  ;;  %v1798_v62 = vpop.permute.xlu1 %1797 }
 0x447   : > { %v4579_v13 = vunpack.i.h.bf16 %v4577_v59  ;;  %v1597_v4 = vadd.f32 %v1581_v44, %v1516_v24  ;;  %v4581_v16 = vunpack.i.l.bf16 %v4580_v20  ;;  %v4582_v30 = vunpack.i.h.bf16 %v4580_v20  ;;  %v4591_v24 = vld [vmem:[#allocation77_spill] sm:$0xff]  ;;  %v4111_v20 = vpop.permute.xlu0 %2228 }
 0x448   : > { %v1330_v7 = vmul.f32 %v4578_v8, %v3768_v53  ;;  %v4584_v12 = vunpack.i.l.bf16 %v4583_v39  ;;  %v1598_v55 = vadd.f32 %v1582_v56, %v1517_v47  ;;  %v4585_v23 = vunpack.i.h.bf16 %v4583_v39 }
 0x449   : > { %v1331_v38 = vmul.f32 %v4579_v13, %v3768_v53  ;;  %v1411_v43 = vmul.f32 %v4581_v16, %v3770_v10  ;;  %v1412_v0 = vmul.f32 %v4582_v30, %v3770_v10  ;;  %v1678_v58 = vadd.f32 %v1662_v35, %v1597_v4  ;;  %v4589_v35 = vld [vmem:[#allocation73_spill] sm:$0xff] }
 0x44a   : > { %v1492_v42 = vmul.f32 %v4584_v12, %v3772_v45  ;;  %v1346_v27 = vadd.f32 %v1330_v7, %v1249_v1  ;;  %v1493_v14 = vmul.f32 %v4585_v23, %v3772_v45  ;;  %v2216_v18 = vunpack.i.h.bf16 %v4054_v33  ;;  %v1878_v12 = vld [vmem:[%s4247_s2 + $0x78] sm:$0xff] }
 0x44b   : > { %v1347_v11 = vadd.f32 %v1331_v38, %v1250_v36  ;;  %v4587_v9 = vunpack.i.l.bf16 %v4586_v46  ;;  %v4588_v44 = vunpack.i.h.bf16 %v4586_v46  ;;  %v1679_v28 = vadd.f32 %v1663_v2, %v1598_v55  ;;  %v1874_v23 = vld [vmem:[%s4247_s2 + $0x58] sm:$0xff] }
 0x44c   : > { %v2215_v56 = vunpack.i.l.bf16 %v4054_v33  ;;  %v1427_v51 = vadd.f32 %v1411_v43, %v1346_v27  ;;  %v1759_v19 = vadd.f32 %v1743_v6, %v1678_v58  ;;  %v4590_v49 = vunpack.i.l.bf16 %v4589_v35  ;;  %v1872_v6 = vld [vmem:[%s4247_s2 + $0x48] sm:$0xff] }
 0x44d   : > { %v1573_v63 = vmul.f32 %v4587_v9, %v3774_v57  ;;  %v1574_v50 = vmul.f32 %v4588_v44, %v3774_v57  ;;  %v1428_v32 = vadd.f32 %v1412_v0, %v1347_v11  ;;  %v4592_v48 = vunpack.i.l.bf16 %v4591_v24 }
 0x44e   : > { %v1654_v60 = vmul.f32 %v4590_v49, %v3776_v41  ;;  %v4593_v47 = vunpack.i.h.bf16 %v4591_v24  ;;  %v1760_v2 = vadd.f32 %v1744_v37, %v1679_v28  ;;  %v1508_v36 = vadd.f32 %v1492_v42, %v1427_v51  ;;  %v1873_v37 = vld [vmem:[%s4247_s2 + $0x50] sm:$0xff] }
 0x44f   : > { %v1735_v1 = vmul.f32 %v4592_v48, %v3778_v3  ;;  %v1509_v33 = vadd.f32 %v1493_v14, %v1428_v32  ;;  %v4594_v59 = vunpack.i.h.bf16 %v4589_v35  ;;  %v1840_v7 = vadd.f32 %v1824_v31, %v1759_v19  ;;  %v1875_v14 = vld [vmem:[%s4247_s2 + $0x60] sm:$0xff]  ;;  %v4597_v19 = vld [vmem:[#allocation63_spill] sm:$0xff]  ;;  %v4600_v24 = vld [vmem:[#allocation64_spill] sm:$0xff] }
 0x450   : > { %v1736_v21 = vmul.f32 %v4593_v47, %v3778_v3  ;;  %v2241_v13 = vunpack.i.h.bf16 %v2239_v29  ;;  %v2240_v38 = vunpack.i.l.bf16 %v2239_v29  ;;  %v1830_v4 = vmul.f32 %v1798_v62, %v3780_v22 }
 0x451   : > { %v1655_v8 = vmul.f32 %v4594_v59, %v3776_v41  ;;  %v1841_v16 = vadd.f32 %v1825_v17, %v1760_v2  ;;  %v1589_v43 = vadd.f32 %v1573_v63, %v1508_v36  ;;  %v1590_v30 = vadd.f32 %v1574_v50, %v1509_v33  ;;  %v4596_v50 = vld [vmem:[#allocation53_spill] sm:$0xff] }
 0x452   : > { %v1816_v0 = vmul.f32 %v2215_v56, %v3780_v22  ;;  %vm1856_vm6 = vcmp.gt.f32.partialorder %v1840_v7, 0.5  ;;  %v1826_v39 = vmul.f32 %v2240_v38, %v3780_v22  ;;  %v1827_v31 = vmul.f32 %v2241_v13, %v3780_v22  ;;  %v1864_v56 = vld [vmem:[%s4247_s2 + $0x8] sm:$0xff]  ;;  %v4603_v2 = vld [vmem:[#allocation69_spill] sm:$0xff]  ;;  %v4606_v38 = vld [vmem:[#allocation74_spill] sm:$0xff] }
 0x453   : > { %v1846_v42 = vadd.f32 %v1830_v4, %v3951_v34  ;;  %vm1857_vm7 = vcmp.gt.f32.partialorder %v1841_v16, 0.5  ;;  %v1888_v55 = vsel %vm1856_vm6, 0.0, %v1872_v6  ;;  %v1670_v27 = vadd.f32 %v1654_v60, %v1589_v43 }
 0x454   : > { %v1671_v11 = vadd.f32 %v1655_v8, %v1590_v30  ;;  %v1889_v17 = vsel %vm1857_vm7, 0.0, %v1873_v37  ;;  %1904 = vst.msk [vmem:[%s4247_s2 + $0x48] sm:$0xff] %vm76_vm0, %v1888_v55  ;;  %v1842_v34 = vadd.f32 %v1826_v39, %v4014_v52  ;;  %v1843_v58 = vadd.f32 %v1827_v31, %v4016_v54  ;;  %v4595_v52 = vld [vmem:[#allocation52_spill] sm:$0xff] }
 0x455   : > { %vm1862_vm5 = vcmp.gt.f32.partialorder %v1846_v42, 0.5  ;;  %1905 = vst.msk [vmem:[%s4247_s2 + $0x50] sm:$0xff] %vm76_vm0, %v1889_v17  ;;  %v1751_v46 = vadd.f32 %v1735_v1, %v1670_v27  ;;  %v1817_v63 = vmul.f32 %v2216_v18, %v3780_v22  ;;  %v1255_v54 = vmul.f32 %v3766_v25, %v4595_v52  ;;  %v1865_v18 = vld [vmem:[%s4247_s2 + $0x10] sm:$0xff] }
 0x456   : > { %v1752_v9 = vadd.f32 %v1736_v21, %v1671_v11  ;;  %v1894_v44 = vsel %vm1862_vm5, 0.0, %v1878_v12  ;;  %vm1858_vm8 = vcmp.gt.f32.partialorder %v1842_v34, 0.5  ;;  %vm1859_vm9 = vcmp.gt.f32.partialorder %v1843_v58, 0.5 }
 0x457   : > { %1910 = vst.msk [vmem:[%s4247_s2 + $0x78] sm:$0xff] %vm76_vm0, %v1894_v44  ;;  %v1256_v28 = vmul.f32 %v3766_v25, %v4596_v50  ;;  %v1832_v51 = vadd.f32 %v1816_v0, %v1751_v46  ;;  %v1890_v29 = vsel %vm1858_vm8, 0.0, %v1874_v23  ;;  %v1891_v62 = vsel %vm1859_vm9, 0.0, %v1875_v14 }
 0x458   : > { %v1833_v32 = vadd.f32 %v1817_v63, %v1752_v9  ;;  %1906 = vst.msk [vmem:[%s4247_s2 + $0x58] sm:$0xff] %vm76_vm0, %v1890_v29  ;;  %v4598_v25 = vunpack.i.l.bf16 %v4597_v19  ;;  %v4599_v49 = vunpack.i.h.bf16 %v4597_v19  ;;  %v4601_v48 = vunpack.i.l.bf16 %v4600_v24 }
 0x459   : > { %v4602_v47 = vunpack.i.h.bf16 %v4600_v24  ;;  %vm1848_vm10 = vcmp.gt.f32.partialorder %v1832_v51, 0.5  ;;  %1907 = vst.msk [vmem:[%s4247_s2 + $0x60] sm:$0xff] %vm76_vm0, %v1891_v62  ;;  %v4604_v36 = vunpack.i.l.bf16 %v4603_v2  ;;  %v4607_v4 = vunpack.i.l.bf16 %v4606_v38 }
 0x45a   : > { %v1336_v35 = vmul.f32 %v4598_v25, %v3768_v53  ;;  %v1337_v60 = vmul.f32 %v4599_v49, %v3768_v53  ;;  %v1417_v1 = vmul.f32 %v4601_v48, %v3770_v10  ;;  %vm1849_vm13 = vcmp.gt.f32.partialorder %v1833_v32, 0.5 }
 0x45b   : > { %v1418_v21 = vmul.f32 %v4602_v47, %v3770_v10  ;;  %v1498_v33 = vmul.f32 %v4604_v36, %v3772_v45  ;;  %v4605_v53 = vunpack.i.h.bf16 %v4603_v2  ;;  %v1880_v8 = vsel %vm1848_vm10, 0.0, %v1864_v56  ;;  %v2244_v10 = vpop.permute.xlu0 %2243 }
 0x45c   : > { %v1881_v6 = vsel %vm1849_vm13, 0.0, %v1865_v18  ;;  %v1352_v7 = vadd.f32 %v1336_v35, %v1255_v54  ;;  %v1353_v13 = vadd.f32 %v1337_v60, %v1256_v28  ;;  %1896 = vst.msk [vmem:[%s4247_s2 + $0x8] sm:$0xff] %vm76_vm0, %v1880_v8  ;;  %v1579_v37 = vmul.f32 %v4607_v4, %v3774_v57 }
 0x45d   : > { %v1499_v59 = vmul.f32 %v4605_v53, %v3772_v45  ;;  %v4608_v16 = vunpack.i.h.bf16 %v4606_v38  ;;  %v4609_v45 = vld [vmem:[#allocation76_spill] sm:$0xff]  ;;  %1897 = vst.msk [vmem:[%s4247_s2 + $0x10] sm:$0xff] %vm76_vm0, %v1881_v6  ;;  %v1741_v55 = vmul.f32 %v2185_v26, %v3778_v3  ;;  %v2246_v27 = vunpack.i.h.bf16 %v2244_v10  ;;  %v1876_v26 = vld [vmem:[%s4247_s2 + $0x68] sm:$0xff] }
 0x45e   : > { %v4610_v30 = vunpack.i.l.bf16 %v4609_v45  ;;  %v4611_v39 = vunpack.i.h.bf16 %v4609_v45  ;;  %v1433_v12 = vadd.f32 %v1417_v1, %v1352_v7  ;;  %v1434_v42 = vadd.f32 %v1418_v21, %v1353_v13 }
 0x45f   : > { %v1580_v43 = vmul.f32 %v4608_v16, %v3774_v57  ;;  %v1742_v57 = vmul.f32 %v2186_v61, %v3778_v3  ;;  %v2245_v11 = vunpack.i.l.bf16 %v2244_v10  ;;  %v2230_v14 = vunpack.i.l.bf16 %v4111_v20  ;;  %v1877_v3 = vld [vmem:[%s4247_s2 + $0x70] sm:$0xff] }
 0x460   : > { %v1660_v0 = vmul.f32 %v4610_v30, %v3776_v41  ;;  %v1661_v31 = vmul.f32 %v4611_v39, %v3776_v41  ;;  %v1514_v17 = vadd.f32 %v1498_v33, %v1433_v12  ;;  %v1515_v23 = vadd.f32 %v1499_v59, %v1434_v42 }
 0x461   : > { %v2231_v41 = vunpack.i.h.bf16 %v4111_v20  ;;  %v1828_v34 = vmul.f32 %v2245_v11, %v3780_v22  ;;  %v1829_v58 = vmul.f32 %v2246_v27, %v3780_v22  ;;  %v1822_v44 = vmul.f32 %v2230_v14, %v3780_v22 }
 0x462   : > { %v1595_v46 = vadd.f32 %v1579_v37, %v1514_v17  ;;  %v1596_v9 = vadd.f32 %v1580_v43, %v1515_v23 }
 0x463   : > { %v1844_v40 = vadd.f32 %v1828_v34, %v3865_v5  ;;  %v1845_v61 = vadd.f32 %v1829_v58, %v3870_v15  ;;  %v1823_v52 = vmul.f32 %v2231_v41, %v3780_v22  ;;  %v1870_v5 = vld [vmem:[%s4247_s2 + $0x38] sm:$0xff]  ;;  %v1871_v15 = vld [vmem:[%s4247_s2 + $0x40] sm:$0xff] }
 0x464   : > { %v1676_v63 = vadd.f32 %v1660_v0, %v1595_v46  ;;  %v1677_v20 = vadd.f32 %v1661_v31, %v1596_v9 }
 0x465   : > { %vm1860_vm14 = vcmp.gt.f32.partialorder %v1844_v40, 0.5  ;;  %vm1861_vm15 = vcmp.gt.f32.partialorder %v1845_v61, 0.5 }
 0x466   : > { %v1757_v54 = vadd.f32 %v1741_v55, %v1676_v63  ;;  %v1758_v50 = vadd.f32 %v1742_v57, %v1677_v20  ;;  %v1892_v28 = vsel %vm1860_vm14, 0.0, %v1876_v26  ;;  %v1893_v56 = vsel %vm1861_vm15, 0.0, %v1877_v3 }
 0x467   : > { %1908 = vst.msk [vmem:[%s4247_s2 + $0x68] sm:$0xff] %vm76_vm0, %v1892_v28 }
 0x468   : > { %v1838_v22 = vadd.f32 %v1822_v44, %v1757_v54  ;;  %v1839_v18 = vadd.f32 %v1823_v52, %v1758_v50  ;;  %1909 = vst.msk [vmem:[%s4247_s2 + $0x70] sm:$0xff] %vm76_vm0, %v1893_v56 }
 0x469   :  { %273 = sbr.rel (!%p271_p0) target bundleno = 277 (0x115), region = 38 }
 0x46a   : > { %vm1854_vm12 = vcmp.gt.f32.partialorder %v1838_v22, 0.5  ;;  %vm1855_vm1 = vcmp.gt.f32.partialorder %v1839_v18, 0.5 }
 0x46b   : > { %v1886_v51 = vsel %vm1854_vm12, 0.0, %v1870_v5  ;;  %v1887_v32 = vsel %vm1855_vm1, 0.0, %v1871_v15 }
 0x46c   : > { %1902 = vst.msk [vmem:[%s4247_s2 + $0x38] sm:$0xff] %vm76_vm0, %v1886_v51 }
 0x46d   : > { %1903 = vst.msk [vmem:[%s4247_s2 + $0x40] sm:$0xff] %vm76_vm0, %v1887_v32 }

</bundles_post_ra>
